<compile_context>
chip_gen: v7x
topology: tpu7x:2x2x1
jax: 0.10.0
libtpu: 0.0.40
codegen_flags: <defaults>
</compile_context>

<pallas_src>
import jax
import jax.numpy as jnp
import numpy as np
from jax import lax
from jax.experimental import pallas as pl
from jax.experimental.pallas import tpu as pltpu

EPS = 1e-5     # torch BatchNorm2d default
CP = 128       # channel padding -> lane-dense stores, MXU-native output width


def _tpu_vmem_bytes():
    try:
        info = pltpu.get_tpu_info()
        for name in ("vmem_capacity_bytes", "vmem_size_bytes", "vmem_bytes"):
            v = getattr(info, name, None)
            if v:
                return int(v)
    except Exception:
        pass
    return 64 * 1024 * 1024          # conservative default (v7x per-core VMEM)


_VMEM_BYTES = _tpu_vmem_bytes()
_VMEM_LIMIT = int(min(_VMEM_BYTES * 3 // 4, 96 * 1024 * 1024))
# v5e/v6e (128 MiB VMEM) take 8192-row matmul tiles, v7x (64 MiB) 4096.
_HARD_ROW_CAP = 8192 if _VMEM_BYTES >= (100 << 20) else 4096


def _compiler_params(semantics):
    return pltpu.CompilerParams(dimension_semantics=semantics,
                                vmem_limit_bytes=_VMEM_LIMIT)


def _round_up(x, m):
    return (x + m - 1) // m * m


def _pick_tile(n, cap, quantum):
    """Largest multiple of `quantum` that divides n and is <= cap (fallback: n itself)."""
    best = None
    t = quantum
    cap = min(cap, n)
    while t <= cap:
        if n % t == 0:
            best = t
        t += quantum
    return best if best is not None else n


def _conv_row_cap(kkc_pad):
    per_row = 2 * 4 * (kkc_pad + CP)            # double-buffered patches + y rows, f32
    return min(max(512, (_VMEM_LIMIT // 3) // per_row), _HARD_ROW_CAP)


# --------------------------------------------------------------------------- kernels

def _conv_stats_kernel(p_ref, w_ref, b_ref, y_ref, s1_ref, s2_ref):
    """Conv-as-matmul + bias; streams y and per-tile channel sum / sum-of-squares."""
    y = jnp.dot(p_ref[...], w_ref[...],
                preferred_element_type=jnp.float32) + b_ref[...]
    y_ref[...] = y
    # Per-tile stats, replicated over 8 sublanes so the output block is an (8, 128)-aligned
    # full tile (unmasked store).  Keeping stats per tile (instead of a cross-step accumulator)
    # keeps this grid axis "parallel" so v7x can shard the matmul across both TensorCores.
    # The wrapper divides the cross-tile reduction by 8.
    s1_ref[...] = jnp.broadcast_to(jnp.sum(y, axis=0, keepdims=True), s1_ref.shape)
    s2_ref[...] = jnp.broadcast_to(jnp.sum(y * y, axis=0, keepdims=True), s2_ref.shape)


def _affine_relu_wpool_kernel(y_ref, sc_ref, sh_ref, o_ref):
    """BN affine + ReLU, then max over the w-pair held in the two lane halves."""
    a = jnp.maximum(y_ref[...] * sc_ref[...] + sh_ref[...], 0.0)
    c = o_ref.shape[-1]
    o_ref[...] = jnp.maximum(a[:, :c], a[:, c:])


def _hpool_kernel(x_ref, o_ref):
    """Max over the h-pair held in the two lane halves."""
    x = x_ref[...]
    l = o_ref.shape[-1]
    o_ref[...] = jnp.maximum(x[:, :l], x[:, l:])


def _fc_kernel(x_ref, w_ref, b_ref, o_ref, acc_ref):
    """Tiled-over-features y = x @ W.T + b with a resident f32 accumulator."""
    k = pl.program_id(0)

    @pl.when(k == 0)
    def _():
        acc_ref[...] = jnp.zeros_like(acc_ref)

    # Contract axis 1 of both operands: x (B, Tf) . w (n, Tf) -> (B, n); no weight transpose.
    acc_ref[...] += lax.dot_general(
        x_ref[...], w_ref[...],
        dimension_numbers=(((1,), (1,)), ((), ())),
        preferred_element_type=jnp.float32)

    @pl.when(k == pl.num_programs(0) - 1)
    def _():
        o_ref[...] = acc_ref[...] + b_ref[...]


# --------------------------------------------------------------------------- wrappers

def conv_bn_relu_pool(x_nhwc, w_oihw, bias, gamma, beta):
    """One torch layerN: Conv2d(k=5, pad=2) + BatchNorm2d (train stats) + ReLU + MaxPool2d(2)."""
    B, H, W, Cin = x_nhwc.shape
    assert H % 4 == 0 and W % 4 == 0, "H, W must be divisible by 4 (two MaxPool2d(2) stages)"
    Cout = w_oihw.shape[0]
    K = 5
    N = B * H * W
    Ho, Wo = H // 2, W // 2

    # --- im2col glue (plain JAX); contraction dim padded 25*Cin -> multiple of 8 ---
    # TODO(synk): build the patch tile inside the kernel from shifted views of a resident
    #             input block to avoid the 25x HBM inflation of im2col at large H, W.
    xp = jnp.pad(x_nhwc, ((0, 0), (2, 2), (2, 2), (0, 0)))
    cols = [xp[:, ki:ki + H, kj:kj + W, :] for ki in range(K) for kj in range(K)]
    patches = jnp.concatenate(cols, axis=-1).reshape(N, K * K * Cin)
    kkc = K * K * Cin
    kkc_pad = _round_up(kkc, 8)
    if kkc_pad != kkc:
        patches = jnp.pad(patches, ((0, 0), (0, kkc_pad - kkc)))

    # Conv weight as (kkc_pad, 128) matrix; output channels zero-padded to 128 lanes.
    w2d = jnp.transpose(w_oihw, (2, 3, 1, 0)).reshape(kkc, Cout)
    w2d = jnp.pad(w2d, ((0, kkc_pad - kkc), (0, CP - Cout)))
    b_p = jnp.pad(bias, (0, CP - Cout)).reshape(1, CP)

    # ---- pass 1: conv matmul + bias + per-tile channel stats (tiled over rows) ----
    tile_m = _pick_tile(N, _conv_row_cap(kkc_pad), 8)
    nt = N // tile_m
    y, s1, s2 = pl.pallas_call(
        _conv_stats_kernel,
        out_shape=(jax.ShapeDtypeStruct((N, CP), jnp.float32),
                   jax.ShapeDtypeStruct((nt * 8, CP), jnp.float32),
                   jax.ShapeDtypeStruct((nt * 8, CP), jnp.float32)),
        grid=(nt,),
        in_specs=[pl.BlockSpec((tile_m, kkc_pad), lambda i: (i, 0)),
                  pl.BlockSpec((kkc_pad, CP), lambda i: (0, 0)),
                  pl.BlockSpec((1, CP), lambda i: (0, 0))],
        out_specs=(pl.BlockSpec((tile_m, CP), lambda i: (i, 0)),
                   pl.BlockSpec((8, CP), lambda i: (i, 0)),
                   pl.BlockSpec((8, CP), lambda i: (i, 0))),
        compiler_params=_compiler_params(("parallel",)),
    )(patches, w2d, b_p)

    # ---- BN train-mode batch stats (biased var, one pass), tiny per-channel glue ----
    inv = 1.0 / (8.0 * N)                       # each tile's sums are replicated 8x
    mean = jnp.sum(s1, axis=0) * inv
    var = jnp.maximum(jnp.sum(s2, axis=0) * inv - mean * mean, 0.0)
    g_p = jnp.pad(gamma, (0, CP - Cout))
    be_p = jnp.pad(beta, (0, CP - Cout))
    scale = g_p * lax.rsqrt(var + EPS)
    shift = be_p - mean * scale

    # ---- pass 2a: affine + ReLU + horizontal (w) pool ----
    # free HBM reshape: rows (b,h,w) -> (b,h,wo) with the w-pair folded into the lane dim.
    y2 = y.reshape(N // 2, 2 * CP)
    sc2 = jnp.tile(scale.reshape(1, CP), (1, 2))
    sh2 = jnp.tile(shift.reshape(1, CP), (1, 2))
    rows_a = N // 2
    tile_a = _pick_tile(rows_a, 4096, 8)
    wm = pl.pallas_call(
        _affine_relu_wpool_kernel,
        out_shape=jax.ShapeDtypeStruct((rows_a, CP), jnp.float32),
        grid=(rows_a // tile_a,),
        in_specs=[pl.BlockSpec((tile_a, 2 * CP), lambda i: (i, 0)),
                  pl.BlockSpec((1, 2 * CP), lambda i: (0, 0)),
                  pl.BlockSpec((1, 2 * CP), lambda i: (0, 0))],
        out_specs=pl.BlockSpec((tile_a, CP), lambda i: (i, 0)),
        compiler_params=_compiler_params(("parallel",)),
    )(y2, sc2, sh2)

    # ---- pass 2b: vertical (h) pool ----
    # rows (b,h,wo) -> (b,ho) with (h-pair, wo, c) folded into the lane dim.
    wm2 = wm.reshape(B * Ho, 2 * Wo * CP)
    rows_b = B * Ho
    tile_b = _pick_tile(rows_b, 1024, 8)
    pooled = pl.pallas_call(
        _hpool_kernel,
        out_shape=jax.ShapeDtypeStruct((rows_b, Wo * CP), jnp.float32),
        grid=(rows_b // tile_b,),
        in_specs=[pl.BlockSpec((tile_b, 2 * Wo * CP), lambda i: (i, 0))],
        out_specs=pl.BlockSpec((tile_b, Wo * CP), lambda i: (i, 0)),
        compiler_params=_compiler_params(("parallel",)),
    )(wm2)

    # Lane-dense kernel output -> NHWC; strip the channel padding in the wrapper.
    return pooled.reshape(B, Ho, Wo, CP)[..., :Cout]


def linear(x, w_nf, b):
    """torch nn.Linear: y = x @ W.T + b, W shape (n_out, n_in).  Tiled over features."""
    B, F = x.shape
    n = w_nf.shape[0]
    tile_f = _pick_tile(F, 16384, 128)
    return pl.pallas_call(
        _fc_kernel,
        out_shape=jax.ShapeDtypeStruct((B, n), jnp.float32),
        grid=(F // tile_f,),
        in_specs=[pl.BlockSpec((B, tile_f), lambda k: (0, k)),
                  pl.BlockSpec((n, tile_f), lambda k: (0, k)),
                  pl.BlockSpec((1, n), lambda k: (0, 0))],
        out_specs=pl.BlockSpec((B, n), lambda k: (0, 0)),
        scratch_shapes=[pltpu.VMEM((B, n), jnp.float32)],
        compiler_params=_compiler_params(("arbitrary",)),
    )(x, w_nf, b.reshape(1, n))


def cnn_forward(x, params):
    (w1, b1, g1, be1, w2, b2, g2, be2, wf, bf) = params
    # x.unsqueeze(1).float() -> single input channel; NHWC internally.
    x = x.astype(jnp.float32)[..., None]                       # (B, H, W, 1)
    out = conv_bn_relu_pool(x, w1, b1, g1, be1)                # (B, H/2, W/2, 16)
    out = conv_bn_relu_pool(out, w2, b2, g2, be2)              # (B, H/4, W/4, 32)
    # torch: out.view(B, -1) on NCHW -> flatten order (C, H, W)
    feat = jnp.transpose(out, (0, 3, 1, 2)).reshape(out.shape[0], -1)
    return linear(feat, wf, bf)                                # (B, classification_n)


def _ref_forward(x, params):
    """Pure-JAX reference of the torch forward (train-mode BN)."""
    (w1, b1, g1, be1, w2, b2, g2, be2, wf, bf) = params
    y = x.astype(jnp.float32)[:, None, :, :]                   # NCHW

    def layer(y, w, b, g, be):
        y = jax.lax.conv_general_dilated(
            y, w, (1, 1), [(2, 2), (2, 2)],
            dimension_numbers=('NCHW', 'OIHW', 'NCHW'))
        y = y + b[None, :, None, None]
        mean = jnp.mean(y, axis=(0, 2, 3), keepdims=True)
        var = jnp.mean((y - mean) ** 2, axis=(0, 2, 3), keepdims=True)
        y = (y - mean) * jax.lax.rsqrt(var + EPS)
        y = y * g[None, :, None, None] + be[None, :, None, None]
        y = jnp.maximum(y, 0.0)
        return jax.lax.reduce_window(y, -jnp.inf, jax.lax.max,
                                     (1, 1, 2, 2), (1, 1, 2, 2), 'VALID')

    y = layer(y, w1, b1, g1, be1)
    y = layer(y, w2, b2, g2, be2)
    y = y.reshape(y.shape[0], -1)
    return y @ wf.T + bf


if __name__ == "__main__":
    B, H, W = 2, 16, 16
    classification_n = 10
    fc_in = 32 * (H // 4) * (W // 4)   # 512 (module hardcodes 80000 for 200x200 inputs)

    key = jax.random.PRNGKey(0)
    ks = jax.random.split(key, 11)
    x = jax.random.normal(ks[0], (B, H, W), dtype=jnp.float32)

    w1 = 0.1 * jax.random.normal(ks[1], (16, 1, 5, 5), dtype=jnp.float32)
    b1 = 0.1 * jax.random.normal(ks[2], (16,), dtype=jnp.float32)
    g1 = 1.0 + 0.1 * jax.random.normal(ks[3], (16,), dtype=jnp.float32)
    be1 = 0.1 * jax.random.normal(ks[4], (16,), dtype=jnp.float32)

    w2 = 0.05 * jax.random.normal(ks[5], (32, 16, 5, 5), dtype=jnp.float32)
    b2 = 0.1 * jax.random.normal(ks[6], (32,), dtype=jnp.float32)
    g2 = 1.0 + 0.1 * jax.random.normal(ks[7], (32,), dtype=jnp.float32)
    be2 = 0.1 * jax.random.normal(ks[8], (32,), dtype=jnp.float32)

    wf = 0.02 * jax.random.normal(ks[9], (classification_n, fc_in), dtype=jnp.float32)
    bf = 0.02 * jax.random.normal(ks[10], (classification_n,), dtype=jnp.float32)

    params = (w1, b1, g1, be1, w2, b2, g2, be2, wf, bf)

    out = jax.jit(cnn_forward)(x, params)
    out = jax.block_until_ready(out)
    assert out.shape == (B, classification_n) and out.dtype == jnp.float32

    ref = jax.block_until_ready(_ref_forward(x, params))
    np.testing.assert_allclose(np.asarray(out), np.asarray(ref),
                               rtol=5e-2, atol=5e-2)

    print("KERNEL_OK")
</pallas_src>

<mosaic_0001>
module attributes {stable_mosaic.version = 11 : i64} {
  func.func @_conv_stats_kernel(%arg0: i32, %arg1: memref<512x32xf32, #tpu.memory_space<vmem>>, %arg2: memref<32x128xf32, #tpu.memory_space<vmem>>, %arg3: memref<1x128xf32, #tpu.memory_space<vmem>>, %arg4: memref<512x128xf32, #tpu.memory_space<vmem>>, %arg5: memref<8x128xf32, #tpu.memory_space<vmem>>, %arg6: memref<8x128xf32, #tpu.memory_space<vmem>>) attributes {dimension_semantics = [#tpu.dimension_semantics<parallel>], iteration_bounds = array<i64: 1>, scalar_prefetch = 0 : i64, scratch_operands = 0 : i64, tpu.core_type = #tpu.core_type<tc>, window_params = [{transform_indices = @transform_0, window_bounds = array<i64: 512, 32>}, {pipeline_mode = #tpu.pipeline_mode<synchronous>, transform_indices = @transform_1, window_bounds = array<i64: 32, 128>}, {pipeline_mode = #tpu.pipeline_mode<synchronous>, transform_indices = @transform_2, window_bounds = array<i64: 1, 128>}, {transform_indices = @transform_3, window_bounds = array<i64: 512, 128>}, {transform_indices = @transform_4, window_bounds = array<i64: 8, 128>}, {transform_indices = @transform_5, window_bounds = array<i64: 8, 128>}]} {
    %c0 = arith.constant 0 : index
    %c0_0 = arith.constant 0 : index
    %0 = vector.load %arg1[%c0, %c0_0] : memref<512x32xf32, #tpu.memory_space<vmem>>, vector<512x32xf32>
    %c0_1 = arith.constant 0 : index
    %c0_2 = arith.constant 0 : index
    %1 = vector.load %arg2[%c0_1, %c0_2] : memref<32x128xf32, #tpu.memory_space<vmem>>, vector<32x128xf32>
    %cst = arith.constant dense<0.000000e+00> : vector<512x128xf32>
    %2 = tpu.matmul %0, %1, %cst {dimension_numbers = #tpu.dot_dimension_numbers<[1], [0], [0], [1], [0, 0, 1, 1], [], []>} : vector<512x32xf32>, vector<32x128xf32>, vector<512x128xf32> -> vector<512x128xf32>
    %c0_3 = arith.constant 0 : index
    %c0_4 = arith.constant 0 : index
    %3 = vector.load %arg3[%c0_3, %c0_4] : memref<1x128xf32, #tpu.memory_space<vmem>>, vector<1x128xf32>
    %4 = vector.broadcast %3 : vector<1x128xf32> to vector<512x128xf32>
    %5 = arith.addf %2, %4 : vector<512x128xf32>
    %c0_5 = arith.constant 0 : index
    %c0_6 = arith.constant 0 : index
    %6 = vector.load %arg4[%c0_5, %c0_6] : memref<512x128xf32, #tpu.memory_space<vmem>>, vector<512x128xf32>
    tpu.vector_store %arg4[%c0_5, %c0_6], %5 {strides = array<i32>} : memref<512x128xf32, #tpu.memory_space<vmem>>, vector<512x128xf32>,
    %cst_7 = arith.constant dense<0.000000e+00> : vector<128xf32>
    %7 = vector.multi_reduction <add>, %5, %cst_7 [0] : vector<512x128xf32> to vector<128xf32>
    %8 = vector.shape_cast %7 : vector<128xf32> to vector<1x128xf32>
    %9 = vector.shape_cast %8 : vector<1x128xf32> to vector<1x128xf32>
    %10 = vector.broadcast %9 : vector<1x128xf32> to vector<8x128xf32>
    %c0_8 = arith.constant 0 : index
    %c0_9 = arith.constant 0 : index
    %11 = vector.load %arg5[%c0_8, %c0_9] : memref<8x128xf32, #tpu.memory_space<vmem>>, vector<8x128xf32>
    tpu.vector_store %arg5[%c0_8, %c0_9], %10 {strides = array<i32>} : memref<8x128xf32, #tpu.memory_space<vmem>>, vector<8x128xf32>,
    %12 = arith.mulf %5, %5 : vector<512x128xf32>
    %cst_10 = arith.constant dense<0.000000e+00> : vector<128xf32>
    %13 = vector.multi_reduction <add>, %12, %cst_10 [0] : vector<512x128xf32> to vector<128xf32>
    %14 = vector.shape_cast %13 : vector<128xf32> to vector<1x128xf32>
    %15 = vector.shape_cast %14 : vector<1x128xf32> to vector<1x128xf32>
    %16 = vector.broadcast %15 : vector<1x128xf32> to vector<8x128xf32>
    %c0_11 = arith.constant 0 : index
    %c0_12 = arith.constant 0 : index
    %17 = vector.load %arg6[%c0_11, %c0_12] : memref<8x128xf32, #tpu.memory_space<vmem>>, vector<8x128xf32>
    tpu.vector_store %arg6[%c0_11, %c0_12], %16 {strides = array<i32>} : memref<8x128xf32, #tpu.memory_space<vmem>>, vector<8x128xf32>,
    return
  }
  func.func @transform_0(%arg0: i32) -> (i32, i32) {
    %c0_i32 = arith.constant 0 : i32
    %c0_i32_0 = arith.constant 0 : i32
    return %arg0, %c0_i32 : i32, i32
  }
  func.func @transform_1(%arg0: i32) -> (i32, i32) {
    %c0_i32 = arith.constant 0 : i32
    %c0_i32_0 = arith.constant 0 : i32
    %c0_i32_1 = arith.constant 0 : i32
    return %c0_i32, %c0_i32_0 : i32, i32
  }
  func.func @transform_2(%arg0: i32) -> (i32, i32) {
    %c0_i32 = arith.constant 0 : i32
    %c0_i32_0 = arith.constant 0 : i32
    %c0_i32_1 = arith.constant 0 : i32
    return %c0_i32, %c0_i32_0 : i32, i32
  }
  func.func @transform_3(%arg0: i32) -> (i32, i32) {
    %c0_i32 = arith.constant 0 : i32
    %c0_i32_0 = arith.constant 0 : i32
    return %arg0, %c0_i32 : i32, i32
  }
  func.func @transform_4(%arg0: i32) -> (i32, i32) {
    %c0_i32 = arith.constant 0 : i32
    %c0_i32_0 = arith.constant 0 : i32
    return %arg0, %c0_i32 : i32, i32
  }
  func.func @transform_5(%arg0: i32) -> (i32, i32) {
    %c0_i32 = arith.constant 0 : i32
    %c0_i32_0 = arith.constant 0 : i32
    return %arg0, %c0_i32 : i32, i32
  }
}

module attributes {stable_mosaic.version = 11 : i64} {
  func.func @_affine_relu_wpool_kernel(%arg0: i32, %arg1: memref<256x256xf32, #tpu.memory_space<vmem>>, %arg2: memref<1x256xf32, #tpu.memory_space<vmem>>, %arg3: memref<1x256xf32, #tpu.memory_space<vmem>>, %arg4: memref<256x128xf32, #tpu.memory_space<vmem>>) attributes {dimension_semantics = [#tpu.dimension_semantics<parallel>], iteration_bounds = array<i64: 1>, scalar_prefetch = 0 : i64, scratch_operands = 0 : i64, tpu.core_type = #tpu.core_type<tc>, window_params = [{transform_indices = @transform_0, window_bounds = array<i64: 256, 256>}, {pipeline_mode = #tpu.pipeline_mode<synchronous>, transform_indices = @transform_1, window_bounds = array<i64: 1, 256>}, {pipeline_mode = #tpu.pipeline_mode<synchronous>, transform_indices = @transform_2, window_bounds = array<i64: 1, 256>}, {transform_indices = @transform_3, window_bounds = array<i64: 256, 128>}]} {
    %c0 = arith.constant 0 : index
    %c0_0 = arith.constant 0 : index
    %0 = vector.load %arg1[%c0, %c0_0] : memref<256x256xf32, #tpu.memory_space<vmem>>, vector<256x256xf32>
    %c0_1 = arith.constant 0 : index
    %c0_2 = arith.constant 0 : index
    %1 = vector.load %arg2[%c0_1, %c0_2] : memref<1x256xf32, #tpu.memory_space<vmem>>, vector<1x256xf32>
    %2 = vector.broadcast %1 : vector<1x256xf32> to vector<256x256xf32>
    %3 = arith.mulf %0, %2 : vector<256x256xf32>
    %c0_3 = arith.constant 0 : index
    %c0_4 = arith.constant 0 : index
    %4 = vector.load %arg3[%c0_3, %c0_4] : memref<1x256xf32, #tpu.memory_space<vmem>>, vector<1x256xf32>
    %5 = vector.broadcast %4 : vector<1x256xf32> to vector<256x256xf32>
    %6 = arith.addf %3, %5 : vector<256x256xf32>
    %cst = arith.constant 0.000000e+00 : f32
    %7 = vector.broadcast %cst : f32 to vector<256x256xf32>
    %8 = arith.maximumf %6, %7 : vector<256x256xf32>
    %9 = vector.extract_strided_slice %8 {offsets = [0, 0], sizes = [256, 128], strides = [1, 1]} : vector<256x256xf32> to vector<256x128xf32>
    %10 = vector.extract_strided_slice %8 {offsets = [0, 128], sizes = [256, 128], strides = [1, 1]} : vector<256x256xf32> to vector<256x128xf32>
    %11 = arith.maximumf %9, %10 : vector<256x128xf32>
    %c0_5 = arith.constant 0 : index
    %c0_6 = arith.constant 0 : index
    %12 = vector.load %arg4[%c0_5, %c0_6] : memref<256x128xf32, #tpu.memory_space<vmem>>, vector<256x128xf32>
    tpu.vector_store %arg4[%c0_5, %c0_6], %11 {strides = array<i32>} : memref<256x128xf32, #tpu.memory_space<vmem>>, vector<256x128xf32>,
    return
  }
  func.func @transform_0(%arg0: i32) -> (i32, i32) {
    %c0_i32 = arith.constant 0 : i32
    %c0_i32_0 = arith.constant 0 : i32
    return %arg0, %c0_i32 : i32, i32
  }
  func.func @transform_1(%arg0: i32) -> (i32, i32) {
    %c0_i32 = arith.constant 0 : i32
    %c0_i32_0 = arith.constant 0 : i32
    %c0_i32_1 = arith.constant 0 : i32
    return %c0_i32, %c0_i32_0 : i32, i32
  }
  func.func @transform_2(%arg0: i32) -> (i32, i32) {
    %c0_i32 = arith.constant 0 : i32
    %c0_i32_0 = arith.constant 0 : i32
    %c0_i32_1 = arith.constant 0 : i32
    return %c0_i32, %c0_i32_0 : i32, i32
  }
  func.func @transform_3(%arg0: i32) -> (i32, i32) {
    %c0_i32 = arith.constant 0 : i32
    %c0_i32_0 = arith.constant 0 : i32
    return %arg0, %c0_i32 : i32, i32
  }
}

module attributes {stable_mosaic.version = 11 : i64} {
  func.func @_hpool_kernel(%arg0: i32, %arg1: memref<16x2048xf32, #tpu.memory_space<vmem>>, %arg2: memref<16x1024xf32, #tpu.memory_space<vmem>>) attributes {dimension_semantics = [#tpu.dimension_semantics<parallel>], iteration_bounds = array<i64: 1>, scalar_prefetch = 0 : i64, scratch_operands = 0 : i64, tpu.core_type = #tpu.core_type<tc>, window_params = [{transform_indices = @transform_0, window_bounds = array<i64: 16, 2048>}, {transform_indices = @transform_1, window_bounds = array<i64: 16, 1024>}]} {
    %c0 = arith.constant 0 : index
    %c0_0 = arith.constant 0 : index
    %0 = vector.load %arg1[%c0, %c0_0] : memref<16x2048xf32, #tpu.memory_space<vmem>>, vector<16x2048xf32>
    %1 = vector.extract_strided_slice %0 {offsets = [0, 0], sizes = [16, 1024], strides = [1, 1]} : vector<16x2048xf32> to vector<16x1024xf32>
    %2 = vector.extract_strided_slice %0 {offsets = [0, 1024], sizes = [16, 1024], strides = [1, 1]} : vector<16x2048xf32> to vector<16x1024xf32>
    %3 = arith.maximumf %1, %2 : vector<16x1024xf32>
    %c0_1 = arith.constant 0 : index
    %c0_2 = arith.constant 0 : index
    %4 = vector.load %arg2[%c0_1, %c0_2] : memref<16x1024xf32, #tpu.memory_space<vmem>>, vector<16x1024xf32>
    tpu.vector_store %arg2[%c0_1, %c0_2], %3 {strides = array<i32>} : memref<16x1024xf32, #tpu.memory_space<vmem>>, vector<16x1024xf32>,
    return
  }
  func.func @transform_0(%arg0: i32) -> (i32, i32) {
    %c0_i32 = arith.constant 0 : i32
    %c0_i32_0 = arith.constant 0 : i32
    return %arg0, %c0_i32 : i32, i32
  }
  func.func @transform_1(%arg0: i32) -> (i32, i32) {
    %c0_i32 = arith.constant 0 : i32
    %c0_i32_0 = arith.constant 0 : i32
    return %arg0, %c0_i32 : i32, i32
  }
}

module attributes {stable_mosaic.version = 11 : i64} {
  func.func @_conv_stats_kernel(%arg0: i32, %arg1: memref<128x400xf32, #tpu.memory_space<vmem>>, %arg2: memref<400x128xf32, #tpu.memory_space<vmem>>, %arg3: memref<1x128xf32, #tpu.memory_space<vmem>>, %arg4: memref<128x128xf32, #tpu.memory_space<vmem>>, %arg5: memref<8x128xf32, #tpu.memory_space<vmem>>, %arg6: memref<8x128xf32, #tpu.memory_space<vmem>>) attributes {dimension_semantics = [#tpu.dimension_semantics<parallel>], iteration_bounds = array<i64: 1>, scalar_prefetch = 0 : i64, scratch_operands = 0 : i64, tpu.core_type = #tpu.core_type<tc>, window_params = [{transform_indices = @transform_0, window_bounds = array<i64: 128, 400>}, {pipeline_mode = #tpu.pipeline_mode<synchronous>, transform_indices = @transform_1, window_bounds = array<i64: 400, 128>}, {pipeline_mode = #tpu.pipeline_mode<synchronous>, transform_indices = @transform_2, window_bounds = array<i64: 1, 128>}, {transform_indices = @transform_3, window_bounds = array<i64: 128, 128>}, {transform_indices = @transform_4, window_bounds = array<i64: 8, 128>}, {transform_indices = @transform_5, window_bounds = array<i64: 8, 128>}]} {
    %c0 = arith.constant 0 : index
    %c0_0 = arith.constant 0 : index
    %0 = vector.load %arg1[%c0, %c0_0] : memref<128x400xf32, #tpu.memory_space<vmem>>, vector<128x400xf32>
    %c0_1 = arith.constant 0 : index
    %c0_2 = arith.constant 0 : index
    %1 = vector.load %arg2[%c0_1, %c0_2] : memref<400x128xf32, #tpu.memory_space<vmem>>, vector<400x128xf32>
    %cst = arith.constant dense<0.000000e+00> : vector<128x128xf32>
    %2 = tpu.matmul %0, %1, %cst {dimension_numbers = #tpu.dot_dimension_numbers<[1], [0], [0], [1], [0, 0, 1, 1], [], []>} : vector<128x400xf32>, vector<400x128xf32>, vector<128x128xf32> -> vector<128x128xf32>
    %c0_3 = arith.constant 0 : index
    %c0_4 = arith.constant 0 : index
    %3 = vector.load %arg3[%c0_3, %c0_4] : memref<1x128xf32, #tpu.memory_space<vmem>>, vector<1x128xf32>
    %4 = vector.broadcast %3 : vector<1x128xf32> to vector<128x128xf32>
    %5 = arith.addf %2, %4 : vector<128x128xf32>
    %c0_5 = arith.constant 0 : index
    %c0_6 = arith.constant 0 : index
    %6 = vector.load %arg4[%c0_5, %c0_6] : memref<128x128xf32, #tpu.memory_space<vmem>>, vector<128x128xf32>
    tpu.vector_store %arg4[%c0_5, %c0_6], %5 {strides = array<i32>} : memref<128x128xf32, #tpu.memory_space<vmem>>, vector<128x128xf32>,
    %cst_7 = arith.constant dense<0.000000e+00> : vector<128xf32>
    %7 = vector.multi_reduction <add>, %5, %cst_7 [0] : vector<128x128xf32> to vector<128xf32>
    %8 = vector.shape_cast %7 : vector<128xf32> to vector<1x128xf32>
    %9 = vector.shape_cast %8 : vector<1x128xf32> to vector<1x128xf32>
    %10 = vector.broadcast %9 : vector<1x128xf32> to vector<8x128xf32>
    %c0_8 = arith.constant 0 : index
    %c0_9 = arith.constant 0 : index
    %11 = vector.load %arg5[%c0_8, %c0_9] : memref<8x128xf32, #tpu.memory_space<vmem>>, vector<8x128xf32>
    tpu.vector_store %arg5[%c0_8, %c0_9], %10 {strides = array<i32>} : memref<8x128xf32, #tpu.memory_space<vmem>>, vector<8x128xf32>,
    %12 = arith.mulf %5, %5 : vector<128x128xf32>
    %cst_10 = arith.constant dense<0.000000e+00> : vector<128xf32>
    %13 = vector.multi_reduction <add>, %12, %cst_10 [0] : vector<128x128xf32> to vector<128xf32>
    %14 = vector.shape_cast %13 : vector<128xf32> to vector<1x128xf32>
    %15 = vector.shape_cast %14 : vector<1x128xf32> to vector<1x128xf32>
    %16 = vector.broadcast %15 : vector<1x128xf32> to vector<8x128xf32>
    %c0_11 = arith.constant 0 : index
    %c0_12 = arith.constant 0 : index
    %17 = vector.load %arg6[%c0_11, %c0_12] : memref<8x128xf32, #tpu.memory_space<vmem>>, vector<8x128xf32>
    tpu.vector_store %arg6[%c0_11, %c0_12], %16 {strides = array<i32>} : memref<8x128xf32, #tpu.memory_space<vmem>>, vector<8x128xf32>,
    return
  }
  func.func @transform_0(%arg0: i32) -> (i32, i32) {
    %c0_i32 = arith.constant 0 : i32
    %c0_i32_0 = arith.constant 0 : i32
    return %arg0, %c0_i32 : i32, i32
  }
  func.func @transform_1(%arg0: i32) -> (i32, i32) {
    %c0_i32 = arith.constant 0 : i32
    %c0_i32_0 = arith.constant 0 : i32
    %c0_i32_1 = arith.constant 0 : i32
    return %c0_i32, %c0_i32_0 : i32, i32
  }
  func.func @transform_2(%arg0: i32) -> (i32, i32) {
    %c0_i32 = arith.constant 0 : i32
    %c0_i32_0 = arith.constant 0 : i32
    %c0_i32_1 = arith.constant 0 : i32
    return %c0_i32, %c0_i32_0 : i32, i32
  }
  func.func @transform_3(%arg0: i32) -> (i32, i32) {
    %c0_i32 = arith.constant 0 : i32
    %c0_i32_0 = arith.constant 0 : i32
    return %arg0, %c0_i32 : i32, i32
  }
  func.func @transform_4(%arg0: i32) -> (i32, i32) {
    %c0_i32 = arith.constant 0 : i32
    %c0_i32_0 = arith.constant 0 : i32
    return %arg0, %c0_i32 : i32, i32
  }
  func.func @transform_5(%arg0: i32) -> (i32, i32) {
    %c0_i32 = arith.constant 0 : i32
    %c0_i32_0 = arith.constant 0 : i32
    return %arg0, %c0_i32 : i32, i32
  }
}

module attributes {stable_mosaic.version = 11 : i64} {
  func.func @_affine_relu_wpool_kernel(%arg0: i32, %arg1: memref<64x256xf32, #tpu.memory_space<vmem>>, %arg2: memref<1x256xf32, #tpu.memory_space<vmem>>, %arg3: memref<1x256xf32, #tpu.memory_space<vmem>>, %arg4: memref<64x128xf32, #tpu.memory_space<vmem>>) attributes {dimension_semantics = [#tpu.dimension_semantics<parallel>], iteration_bounds = array<i64: 1>, scalar_prefetch = 0 : i64, scratch_operands = 0 : i64, tpu.core_type = #tpu.core_type<tc>, window_params = [{transform_indices = @transform_0, window_bounds = array<i64: 64, 256>}, {pipeline_mode = #tpu.pipeline_mode<synchronous>, transform_indices = @transform_1, window_bounds = array<i64: 1, 256>}, {pipeline_mode = #tpu.pipeline_mode<synchronous>, transform_indices = @transform_2, window_bounds = array<i64: 1, 256>}, {transform_indices = @transform_3, window_bounds = array<i64: 64, 128>}]} {
    %c0 = arith.constant 0 : index
    %c0_0 = arith.constant 0 : index
    %0 = vector.load %arg1[%c0, %c0_0] : memref<64x256xf32, #tpu.memory_space<vmem>>, vector<64x256xf32>
    %c0_1 = arith.constant 0 : index
    %c0_2 = arith.constant 0 : index
    %1 = vector.load %arg2[%c0_1, %c0_2] : memref<1x256xf32, #tpu.memory_space<vmem>>, vector<1x256xf32>
    %2 = vector.broadcast %1 : vector<1x256xf32> to vector<64x256xf32>
    %3 = arith.mulf %0, %2 : vector<64x256xf32>
    %c0_3 = arith.constant 0 : index
    %c0_4 = arith.constant 0 : index
    %4 = vector.load %arg3[%c0_3, %c0_4] : memref<1x256xf32, #tpu.memory_space<vmem>>, vector<1x256xf32>
    %5 = vector.broadcast %4 : vector<1x256xf32> to vector<64x256xf32>
    %6 = arith.addf %3, %5 : vector<64x256xf32>
    %cst = arith.constant 0.000000e+00 : f32
    %7 = vector.broadcast %cst : f32 to vector<64x256xf32>
    %8 = arith.maximumf %6, %7 : vector<64x256xf32>
    %9 = vector.extract_strided_slice %8 {offsets = [0, 0], sizes = [64, 128], strides = [1, 1]} : vector<64x256xf32> to vector<64x128xf32>
    %10 = vector.extract_strided_slice %8 {offsets = [0, 128], sizes = [64, 128], strides = [1, 1]} : vector<64x256xf32> to vector<64x128xf32>
    %11 = arith.maximumf %9, %10 : vector<64x128xf32>
    %c0_5 = arith.constant 0 : index
    %c0_6 = arith.constant 0 : index
    %12 = vector.load %arg4[%c0_5, %c0_6] : memref<64x128xf32, #tpu.memory_space<vmem>>, vector<64x128xf32>
    tpu.vector_store %arg4[%c0_5, %c0_6], %11 {strides = array<i32>} : memref<64x128xf32, #tpu.memory_space<vmem>>, vector<64x128xf32>,
    return
  }
  func.func @transform_0(%arg0: i32) -> (i32, i32) {
    %c0_i32 = arith.constant 0 : i32
    %c0_i32_0 = arith.constant 0 : i32
    return %arg0, %c0_i32 : i32, i32
  }
  func.func @transform_1(%arg0: i32) -> (i32, i32) {
    %c0_i32 = arith.constant 0 : i32
    %c0_i32_0 = arith.constant 0 : i32
    %c0_i32_1 = arith.constant 0 : i32
    return %c0_i32, %c0_i32_0 : i32, i32
  }
  func.func @transform_2(%arg0: i32) -> (i32, i32) {
    %c0_i32 = arith.constant 0 : i32
    %c0_i32_0 = arith.constant 0 : i32
    %c0_i32_1 = arith.constant 0 : i32
    return %c0_i32, %c0_i32_0 : i32, i32
  }
  func.func @transform_3(%arg0: i32) -> (i32, i32) {
    %c0_i32 = arith.constant 0 : i32
    %c0_i32_0 = arith.constant 0 : i32
    return %arg0, %c0_i32 : i32, i32
  }
}

module attributes {stable_mosaic.version = 11 : i64} {
  func.func @_hpool_kernel(%arg0: i32, %arg1: memref<8x1024xf32, #tpu.memory_space<vmem>>, %arg2: memref<8x512xf32, #tpu.memory_space<vmem>>) attributes {dimension_semantics = [#tpu.dimension_semantics<parallel>], iteration_bounds = array<i64: 1>, scalar_prefetch = 0 : i64, scratch_operands = 0 : i64, tpu.core_type = #tpu.core_type<tc>, window_params = [{transform_indices = @transform_0, window_bounds = array<i64: 8, 1024>}, {transform_indices = @transform_1, window_bounds = array<i64: 8, 512>}]} {
    %c0 = arith.constant 0 : index
    %c0_0 = arith.constant 0 : index
    %0 = vector.load %arg1[%c0, %c0_0] : memref<8x1024xf32, #tpu.memory_space<vmem>>, vector<8x1024xf32>
    %1 = vector.extract_strided_slice %0 {offsets = [0, 0], sizes = [8, 512], strides = [1, 1]} : vector<8x1024xf32> to vector<8x512xf32>
    %2 = vector.extract_strided_slice %0 {offsets = [0, 512], sizes = [8, 512], strides = [1, 1]} : vector<8x1024xf32> to vector<8x512xf32>
    %3 = arith.maximumf %1, %2 : vector<8x512xf32>
    %c0_1 = arith.constant 0 : index
    %c0_2 = arith.constant 0 : index
    %4 = vector.load %arg2[%c0_1, %c0_2] : memref<8x512xf32, #tpu.memory_space<vmem>>, vector<8x512xf32>
    tpu.vector_store %arg2[%c0_1, %c0_2], %3 {strides = array<i32>} : memref<8x512xf32, #tpu.memory_space<vmem>>, vector<8x512xf32>,
    return
  }
  func.func @transform_0(%arg0: i32) -> (i32, i32) {
    %c0_i32 = arith.constant 0 : i32
    %c0_i32_0 = arith.constant 0 : i32
    return %arg0, %c0_i32 : i32, i32
  }
  func.func @transform_1(%arg0: i32) -> (i32, i32) {
    %c0_i32 = arith.constant 0 : i32
    %c0_i32_0 = arith.constant 0 : i32
    return %arg0, %c0_i32 : i32, i32
  }
}

module attributes {stable_mosaic.version = 11 : i64} {
  func.func @_fc_kernel(%arg0: i32, %arg1: memref<2x512xf32, #tpu.memory_space<vmem>>, %arg2: memref<10x512xf32, #tpu.memory_space<vmem>>, %arg3: memref<1x10xf32, #tpu.memory_space<vmem>>, %arg4: memref<2x10xf32, #tpu.memory_space<vmem>>, %arg5: memref<2x10xf32, #tpu.memory_space<vmem>>) attributes {dimension_semantics = [#tpu.dimension_semantics<arbitrary>], iteration_bounds = array<i64: 1>, scalar_prefetch = 0 : i64, scratch_operands = 1 : i64, tpu.core_type = #tpu.core_type<tc>, window_params = [{transform_indices = @transform_0, window_bounds = array<i64: 2, 512>}, {transform_indices = @transform_1, window_bounds = array<i64: 10, 512>}, {pipeline_mode = #tpu.pipeline_mode<synchronous>, transform_indices = @transform_2, window_bounds = array<i64: 1, 10>}, {pipeline_mode = #tpu.pipeline_mode<synchronous>, transform_indices = @transform_3, window_bounds = array<i64: 2, 10>}]} {
    %c0_i32 = arith.constant 0 : i32
    %0 = arith.cmpi eq, %arg0, %c0_i32 : i32
    %1 = arith.extui %0 : i1 to i32
    %c0_i32_0 = arith.constant 0 : i32
    %2 = arith.cmpi ne, %1, %c0_i32_0 : i32
    scf.if %2 {
      %cst_10 = arith.constant 0.000000e+00 : f32
      %12 = vector.broadcast %cst_10 : f32 to vector<2x10xf32>
      %c0_11 = arith.constant 0 : index
      %c0_12 = arith.constant 0 : index
      %13 = vector.load %arg5[%c0_11, %c0_12] : memref<2x10xf32, #tpu.memory_space<vmem>>, vector<2x10xf32>
      tpu.vector_store %arg5[%c0_11, %c0_12], %12 {strides = array<i32>} : memref<2x10xf32, #tpu.memory_space<vmem>>, vector<2x10xf32>,
    } else {
    }
    %c0 = arith.constant 0 : index
    %c0_1 = arith.constant 0 : index
    %3 = vector.load %arg5[%c0, %c0_1] : memref<2x10xf32, #tpu.memory_space<vmem>>, vector<2x10xf32>
    %c0_2 = arith.constant 0 : index
    %c0_3 = arith.constant 0 : index
    %4 = vector.load %arg1[%c0_2, %c0_3] : memref<2x512xf32, #tpu.memory_space<vmem>>, vector<2x512xf32>
    %c0_4 = arith.constant 0 : index
    %c0_5 = arith.constant 0 : index
    %5 = vector.load %arg2[%c0_4, %c0_5] : memref<10x512xf32, #tpu.memory_space<vmem>>, vector<10x512xf32>
    %cst = arith.constant dense<0.000000e+00> : vector<2x10xf32>
    %6 = tpu.matmul %4, %5, %cst {dimension_numbers = #tpu.dot_dimension_numbers<[1], [1], [0], [0], [0, 0, 1, 0], [], []>} : vector<2x512xf32>, vector<10x512xf32>, vector<2x10xf32> -> vector<2x10xf32>
    %7 = arith.addf %3, %6 : vector<2x10xf32>
    %c0_6 = arith.constant 0 : index
    %c0_7 = arith.constant 0 : index
    %8 = vector.load %arg5[%c0_6, %c0_7] : memref<2x10xf32, #tpu.memory_space<vmem>>, vector<2x10xf32>
    tpu.vector_store %arg5[%c0_6, %c0_7], %7 {strides = array<i32>} : memref<2x10xf32, #tpu.memory_space<vmem>>, vector<2x10xf32>,
    %c0_i32_8 = arith.constant 0 : i32
    %9 = arith.cmpi eq, %arg0, %c0_i32_8 : i32
    %10 = arith.extui %9 : i1 to i32
    %c0_i32_9 = arith.constant 0 : i32
    %11 = arith.cmpi ne, %10, %c0_i32_9 : i32
    scf.if %11 {
      %c0_10 = arith.constant 0 : index
      %c0_11 = arith.constant 0 : index
      %12 = vector.load %arg5[%c0_10, %c0_11] : memref<2x10xf32, #tpu.memory_space<vmem>>, vector<2x10xf32>
      %c0_12 = arith.constant 0 : index
      %c0_13 = arith.constant 0 : index
      %13 = vector.load %arg3[%c0_12, %c0_13] : memref<1x10xf32, #tpu.memory_space<vmem>>, vector<1x10xf32>
      %14 = vector.broadcast %13 : vector<1x10xf32> to vector<2x10xf32>
      %15 = arith.addf %12, %14 : vector<2x10xf32>
      %c0_14 = arith.constant 0 : index
      %c0_15 = arith.constant 0 : index
      %16 = vector.load %arg4[%c0_14, %c0_15] : memref<2x10xf32, #tpu.memory_space<vmem>>, vector<2x10xf32>
      tpu.vector_store %arg4[%c0_14, %c0_15], %15 {strides = array<i32>} : memref<2x10xf32, #tpu.memory_space<vmem>>, vector<2x10xf32>,
    } else {
    }
    return
  }
  func.func @transform_0(%arg0: i32) -> (i32, i32) {
    %c0_i32 = arith.constant 0 : i32
    %c0_i32_0 = arith.constant 0 : i32
    return %c0_i32, %arg0 : i32, i32
  }
  func.func @transform_1(%arg0: i32) -> (i32, i32) {
    %c0_i32 = arith.constant 0 : i32
    %c0_i32_0 = arith.constant 0 : i32
    return %c0_i32, %arg0 : i32, i32
  }
  func.func @transform_2(%arg0: i32) -> (i32, i32) {
    %c0_i32 = arith.constant 0 : i32
    %c0_i32_0 = arith.constant 0 : i32
    %c0_i32_1 = arith.constant 0 : i32
    return %c0_i32, %c0_i32_0 : i32, i32
  }
  func.func @transform_3(%arg0: i32) -> (i32, i32) {
    %c0_i32 = arith.constant 0 : i32
    %c0_i32_0 = arith.constant 0 : i32
    %c0_i32_1 = arith.constant 0 : i32
    return %c0_i32, %c0_i32_0 : i32, i32
  }
}

</mosaic_0001>

<bundles_post_ra>
// kernel: cnn_forward.9
= control target key start
LH: loop header
LB: loop body
LE: loop exit
PB: predicated region body
PF: predicated region fallthrough
CT: control target
= control target key end

     0   :  { %s230_s0 = inlined_call_operand.vmem [shape: f32[16,2048], index: 0, kind: input, shape index: {}]   ;;  %s231_s1 = inlined_call_operand.vmem [shape: f32[16,1024], index: 1, kind: output, shape index: {}]  }
   0x1   :  { %v8_v0 = vld [vmem:[%s230_s0] sm:$0xff]  ;;  %v9_v2 = vld [vmem:[%s230_s0 + $0x8] sm:$0xff]  ;;  %v10_v5 = vld [vmem:[%s230_s0 + $0x10] sm:$0xff] }
   0x2   :  { %v16_v1 = vld [vmem:[%s230_s0 + $0x40] sm:$0xff]  ;;  %v17_v4 = vld [vmem:[%s230_s0 + $0x48] sm:$0xff]  ;;  %v18_v6 = vld [vmem:[%s230_s0 + $0x50] sm:$0xff] }
   0x3   :  { %v40_v3 = vmax.f32 %v8_v0, %v16_v1  ;;  %v41_v7 = vmax.f32 %v9_v2, %v17_v4  ;;  %v42_v8 = vmax.f32 %v10_v5, %v18_v6  ;;  %v11_v9 = vld [vmem:[%s230_s0 + $0x18] sm:$0xff]  ;;  %v12_v11 = vld [vmem:[%s230_s0 + $0x20] sm:$0xff]  ;;  %v13_v14 = vld [vmem:[%s230_s0 + $0x28] sm:$0xff] }
   0x4   :  { %v19_v10 = vld [vmem:[%s230_s0 + $0x58] sm:$0xff]  ;;  %v20_v13 = vld [vmem:[%s230_s0 + $0x60] sm:$0xff]  ;;  %v21_v15 = vld [vmem:[%s230_s0 + $0x68] sm:$0xff] }
   0x5   :  { %56 = vst [vmem:[%s231_s1] sm:$0xff] %v40_v3  ;;  %v43_v12 = vmax.f32 %v11_v9, %v19_v10  ;;  %57 = vst [vmem:[%s231_s1 + $0x8] sm:$0xff] %v41_v7  ;;  %v44_v16 = vmax.f32 %v12_v11, %v20_v13  ;;  %v45_v17 = vmax.f32 %v13_v14, %v21_v15  ;;  %v14_v18 = vld [vmem:[%s230_s0 + $0x30] sm:$0xff]  ;;  %v15_v20 = vld [vmem:[%s230_s0 + $0x38] sm:$0xff] }
   0x6   :  { %58 = vst [vmem:[%s231_s1 + $0x10] sm:$0xff] %v42_v8  ;;  %v22_v19 = vld [vmem:[%s230_s0 + $0x70] sm:$0xff]  ;;  %v23_v22 = vld [vmem:[%s230_s0 + $0x78] sm:$0xff]  ;;  %v24_v23 = vld [vmem:[%s230_s0 + $0x80] sm:$0xff] }
   0x7   :  { %59 = vst [vmem:[%s231_s1 + $0x18] sm:$0xff] %v43_v12  ;;  %v46_v21 = vmax.f32 %v14_v18, %v22_v19  ;;  %v32_v24 = vld [vmem:[%s230_s0 + $0xc0] sm:$0xff]  ;;  %60 = vst [vmem:[%s231_s1 + $0x20] sm:$0xff] %v44_v16  ;;  %v47_v25 = vmax.f32 %v15_v20, %v23_v22  ;;  %v25_v27 = vld [vmem:[%s230_s0 + $0x88] sm:$0xff] }
   0x8   :  { %61 = vst [vmem:[%s231_s1 + $0x28] sm:$0xff] %v45_v17  ;;  %v48_v26 = vmax.f32 %v24_v23, %v32_v24  ;;  %v33_v28 = vld [vmem:[%s230_s0 + $0xc8] sm:$0xff]  ;;  %v26_v29 = vld [vmem:[%s230_s0 + $0x90] sm:$0xff]  ;;  %v27_v32 = vld [vmem:[%s230_s0 + $0x98] sm:$0xff] }
   0x9   :  { %62 = vst [vmem:[%s231_s1 + $0x30] sm:$0xff] %v46_v21  ;;  %v49_v30 = vmax.f32 %v25_v27, %v33_v28  ;;  %v34_v31 = vld [vmem:[%s230_s0 + $0xd0] sm:$0xff]  ;;  %v35_v33 = vld [vmem:[%s230_s0 + $0xd8] sm:$0xff]  ;;  %63 = vst [vmem:[%s231_s1 + $0x38] sm:$0xff] %v47_v25 }
   0xa   :  { %64 = vst [vmem:[%s231_s1 + $0x40] sm:$0xff] %v48_v26  ;;  %v50_v34 = vmax.f32 %v26_v29, %v34_v31  ;;  %v51_v35 = vmax.f32 %v27_v32, %v35_v33  ;;  %v28_v36 = vld [vmem:[%s230_s0 + $0xa0] sm:$0xff]  ;;  %v29_v38 = vld [vmem:[%s230_s0 + $0xa8] sm:$0xff]  ;;  %v30_v41 = vld [vmem:[%s230_s0 + $0xb0] sm:$0xff] }
   0xb   :  { %v36_v37 = vld [vmem:[%s230_s0 + $0xe0] sm:$0xff]  ;;  %65 = vst [vmem:[%s231_s1 + $0x48] sm:$0xff] %v49_v30  ;;  %v37_v40 = vld [vmem:[%s230_s0 + $0xe8] sm:$0xff]  ;;  %v38_v42 = vld [vmem:[%s230_s0 + $0xf0] sm:$0xff] }
   0xc   :  { %v52_v39 = vmax.f32 %v28_v36, %v36_v37  ;;  %66 = vst [vmem:[%s231_s1 + $0x50] sm:$0xff] %v50_v34  ;;  %67 = vst [vmem:[%s231_s1 + $0x58] sm:$0xff] %v51_v35  ;;  %v53_v43 = vmax.f32 %v29_v38, %v37_v40  ;;  %v54_v44 = vmax.f32 %v30_v41, %v38_v42  ;;  %v31_v45 = vld [vmem:[%s230_s0 + $0xb8] sm:$0xff] }
   0xd   :  { %v39_v46 = vld [vmem:[%s230_s0 + $0xf8] sm:$0xff] }
   0xe   :  { %68 = vst [vmem:[%s231_s1 + $0x60] sm:$0xff] %v52_v39  ;;  %v55_v47 = vmax.f32 %v31_v45, %v39_v46  ;;  %69 = vst [vmem:[%s231_s1 + $0x68] sm:$0xff] %v53_v43 }
   0xf   :  { %70 = vst [vmem:[%s231_s1 + $0x70] sm:$0xff] %v54_v44 }
  0x10   :  { %71 = vst [vmem:[%s231_s1 + $0x78] sm:$0xff] %v55_v47 }

// kernel: cnn_forward.8
= control target key start
LH: loop header
LB: loop body
LE: loop exit
PB: predicated region body
PF: predicated region fallthrough
CT: control target
= control target key end

     0   :  { %v80_v0 = vlaneseq  ;;  %s812_s1 = inlined_call_operand.vmem [shape: f32[1,256], index: 1, kind: input, shape index: {}]   ;;  %s813_s2 = inlined_call_operand.vmem [shape: f32[1,256], index: 2, kind: input, shape index: {}]   ;;  %s814_s0 = inlined_call_operand.vmem [shape: f32[256,256], index: 0, kind: input, shape index: {}]   ;;  %s815_s3 = inlined_call_operand.vmem [shape: f32[256,128], index: 3, kind: output, shape index: {}]  }
   0x1   :  { %v78_v2 = vld [vmem:[%s812_s1] sm:$0x3]  ;;  %v15_v5 = vld [vmem:[%s814_s0 + $0x8] sm:$0xff]  ;;  %v16_v8 = vld [vmem:[%s814_s0 + $0x10] sm:$0xff] }
   0x2   :  { %v81_v1 = vshrl.u32 %v80_v0, 7  ;;  %v154_v3 = vld [vmem:[%s813_s2] sm:$0x3]  ;;  %v17_v9 = vld [vmem:[%s814_s0 + $0x18] sm:$0xff]  ;;  %v19_v15 = vld [vmem:[%s814_s0 + $0x28] sm:$0xff] }
   0x3   :  { %v14_v4 = vld [vmem:[%s814_s0] sm:$0xff]  ;;  %v20_v16 = vld [vmem:[%s814_s0 + $0x30] sm:$0xff]  ;;  %v21_v17 = vld [vmem:[%s814_s0 + $0x38] sm:$0xff] }
   0x4   :  { %v82_v6 = vsub.s32 0, %v81_v1  ;;  %v86_v7 = vsub.s32 1, %v81_v1  ;;  %v18_v10 = vld [vmem:[%s814_s0 + $0x20] sm:$0xff]  ;;  %v23_v35 = vld [vmem:[%s814_s0 + $0x48] sm:$0xff]  ;;  %v24_v40 = vld [vmem:[%s814_s0 + $0x50] sm:$0xff] }
   0x5   :  { %v22_v34 = vld [vmem:[%s814_s0 + $0x40] sm:$0xff]  ;;  %v25_v41 = vld [vmem:[%s814_s0 + $0x58] sm:$0xff]  ;;  %v27_v47 = vld [vmem:[%s814_s0 + $0x68] sm:$0xff] }
   0x6   :  { %v403_v11 = vrot.slane %v78_v2, %v82_v6  ;;  %v405_v12 = vrot.slane %v78_v2, %v86_v7  ;;  %v407_v13 = vrot.slane %v154_v3, %v82_v6  ;;  %v409_v14 = vrot.slane %v154_v3, %v86_v7  ;;  %v26_v46 = vld [vmem:[%s814_s0 + $0x60] sm:$0xff]  ;;  %v28_v52 = vld [vmem:[%s814_s0 + $0x70] sm:$0xff]  ;;  %v29_v53 = vld [vmem:[%s814_s0 + $0x78] sm:$0xff] }
   0x7   :  { %v30_v2 = vld [vmem:[%s814_s0 + $0x80] sm:$0xff]  ;;  %v31_v7 = vld [vmem:[%s814_s0 + $0x88] sm:$0xff] }
   0x8   :  { %v90_v18 = vmul.f32 %v403_v11, %v14_v4  ;;  %v91_v19 = vmul.f32 %v405_v12, %v15_v5  ;;  %v92_v20 = vmul.f32 %v403_v11, %v16_v8  ;;  %v93_v21 = vmul.f32 %v405_v12, %v17_v9 }
   0x9   :  { %v94_v22 = vmul.f32 %v403_v11, %v18_v10  ;;  %v95_v23 = vmul.f32 %v405_v12, %v19_v15  ;;  %v96_v24 = vmul.f32 %v403_v11, %v20_v16  ;;  %v97_v25 = vmul.f32 %v405_v12, %v21_v17  ;;  %v32_v16 = vld [vmem:[%s814_s0 + $0x90] sm:$0xff]  ;;  %v33_v17 = vld [vmem:[%s814_s0 + $0x98] sm:$0xff] }
   0xa   :  { %v166_v26 = vadd.f32 %v407_v13, %v90_v18  ;;  %v167_v27 = vadd.f32 %v409_v14, %v91_v19  ;;  %v168_v28 = vadd.f32 %v407_v13, %v92_v20  ;;  %v169_v29 = vadd.f32 %v409_v14, %v93_v21 }
   0xb   :  { %v170_v30 = vadd.f32 %v407_v13, %v94_v22  ;;  %v171_v31 = vadd.f32 %v409_v14, %v95_v23  ;;  %v172_v32 = vadd.f32 %v407_v13, %v96_v24  ;;  %v173_v33 = vadd.f32 %v409_v14, %v97_v25  ;;  %v34_v22 = vld [vmem:[%s814_s0 + $0xa0] sm:$0xff]  ;;  %v35_v23 = vld [vmem:[%s814_s0 + $0xa8] sm:$0xff] }
   0xc   :  { %v230_v36 = vmax.f32 %v166_v26, 0.0  ;;  %v231_v37 = vmax.f32 %v167_v27, 0.0  ;;  %v232_v38 = vmax.f32 %v168_v28, 0.0  ;;  %v233_v39 = vmax.f32 %v169_v29, 0.0  ;;  %v36_v28 = vld [vmem:[%s814_s0 + $0xb0] sm:$0xff] }
   0xd   :  { %v234_v42 = vmax.f32 %v170_v30, 0.0  ;;  %v235_v43 = vmax.f32 %v171_v31, 0.0  ;;  %v236_v44 = vmax.f32 %v172_v32, 0.0  ;;  %v237_v45 = vmax.f32 %v173_v33, 0.0  ;;  %v37_v33 = vld [vmem:[%s814_s0 + $0xb8] sm:$0xff] }
   0xe   :  { %v294_v48 = vmax.f32 %v230_v36, %v231_v37  ;;  %v295_v49 = vmax.f32 %v232_v38, %v233_v39  ;;  %v98_v50 = vmul.f32 %v403_v11, %v22_v34  ;;  %v99_v51 = vmul.f32 %v405_v12, %v23_v35  ;;  %v38_v38 = vld [vmem:[%s814_s0 + $0xc0] sm:$0xff] }
   0xf   :  { %v296_v54 = vmax.f32 %v234_v42, %v235_v43  ;;  %v297_v55 = vmax.f32 %v236_v44, %v237_v45  ;;  %v100_v56 = vmul.f32 %v403_v11, %v24_v40  ;;  %v101_v57 = vmul.f32 %v405_v12, %v25_v41 }
  0x10   :  { %326 = vst [vmem:[%s815_s3] sm:$0xff] %v294_v48  ;;  %327 = vst [vmem:[%s815_s3 + $0x8] sm:$0xff] %v295_v49  ;;  %v174_v58 = vadd.f32 %v407_v13, %v98_v50  ;;  %v175_v59 = vadd.f32 %v409_v14, %v99_v51  ;;  %v102_v60 = vmul.f32 %v403_v11, %v26_v46 }
  0x11   :  { %v103_v61 = vmul.f32 %v405_v12, %v27_v47  ;;  %328 = vst [vmem:[%s815_s3 + $0x10] sm:$0xff] %v296_v54  ;;  %329 = vst [vmem:[%s815_s3 + $0x18] sm:$0xff] %v297_v55  ;;  %v176_v62 = vadd.f32 %v407_v13, %v100_v56  ;;  %v177_v63 = vadd.f32 %v409_v14, %v101_v57  ;;  %v39_v47 = vld [vmem:[%s814_s0 + $0xc8] sm:$0xff] }
  0x12   :  { %v104_v0 = vmul.f32 %v403_v11, %v28_v52  ;;  %v105_v1 = vmul.f32 %v405_v12, %v29_v53  ;;  %v238_v3 = vmax.f32 %v174_v58, 0.0  ;;  %v239_v4 = vmax.f32 %v175_v59, 0.0  ;;  %v40_v52 = vld [vmem:[%s814_s0 + $0xd0] sm:$0xff]  ;;  %v41_v53 = vld [vmem:[%s814_s0 + $0xd8] sm:$0xff]  ;;  %v42_v58 = vld [vmem:[%s814_s0 + $0xe0] sm:$0xff] }
  0x13   :  { %v178_v5 = vadd.f32 %v407_v13, %v102_v60  ;;  %v179_v6 = vadd.f32 %v409_v14, %v103_v61  ;;  %v240_v8 = vmax.f32 %v176_v62, 0.0  ;;  %v241_v9 = vmax.f32 %v177_v63, 0.0  ;;  %v43_v59 = vld [vmem:[%s814_s0 + $0xe8] sm:$0xff] }
  0x14   :  { %v180_v10 = vadd.f32 %v407_v13, %v104_v0  ;;  %v181_v15 = vadd.f32 %v409_v14, %v105_v1  ;;  %v298_v18 = vmax.f32 %v238_v3, %v239_v4  ;;  %v106_v21 = vmul.f32 %v403_v11, %v30_v2  ;;  %v44_v0 = vld [vmem:[%s814_s0 + $0xf0] sm:$0xff] }
  0x15   :  { %v242_v19 = vmax.f32 %v178_v5, 0.0  ;;  %v243_v20 = vmax.f32 %v179_v6, 0.0  ;;  %v299_v24 = vmax.f32 %v240_v8, %v241_v9  ;;  %v107_v27 = vmul.f32 %v405_v12, %v31_v7  ;;  %v45_v5 = vld [vmem:[%s814_s0 + $0xf8] sm:$0xff] }
  0x16   :  { %v244_v25 = vmax.f32 %v180_v10, 0.0  ;;  %v245_v26 = vmax.f32 %v181_v15, 0.0  ;;  %330 = vst [vmem:[%s815_s3 + $0x20] sm:$0xff] %v298_v18  ;;  %v182_v30 = vadd.f32 %v407_v13, %v106_v21  ;;  %v108_v31 = vmul.f32 %v403_v11, %v32_v16  ;;  %v46_v10 = vld [vmem:[%s814_s0 + $0x100] sm:$0xff] }
  0x17   :  { %v300_v29 = vmax.f32 %v242_v19, %v243_v20  ;;  %v109_v32 = vmul.f32 %v405_v12, %v33_v17  ;;  %331 = vst [vmem:[%s815_s3 + $0x28] sm:$0xff] %v299_v24  ;;  %v183_v35 = vadd.f32 %v409_v14, %v107_v27  ;;  %v110_v36 = vmul.f32 %v403_v11, %v34_v22 }
  0x18   :  { %v301_v34 = vmax.f32 %v244_v25, %v245_v26  ;;  %v111_v37 = vmul.f32 %v405_v12, %v35_v23  ;;  %v246_v39 = vmax.f32 %v182_v30, 0.0  ;;  %v184_v40 = vadd.f32 %v407_v13, %v108_v31  ;;  %v47_v23 = vld [vmem:[%s814_s0 + $0x108] sm:$0xff] }
  0x19   :  { %332 = vst [vmem:[%s815_s3 + $0x30] sm:$0xff] %v300_v29  ;;  %v185_v41 = vadd.f32 %v409_v14, %v109_v32  ;;  %v112_v42 = vmul.f32 %v403_v11, %v36_v28  ;;  %v247_v43 = vmax.f32 %v183_v35, 0.0  ;;  %v186_v44 = vadd.f32 %v407_v13, %v110_v36  ;;  %v48_v28 = vld [vmem:[%s814_s0 + $0x110] sm:$0xff]  ;;  %v49_v29 = vld [vmem:[%s814_s0 + $0x118] sm:$0xff]  ;;  %v51_v35 = vld [vmem:[%s814_s0 + $0x128] sm:$0xff] }
  0x1a   :  { %333 = vst [vmem:[%s815_s3 + $0x38] sm:$0xff] %v301_v34  ;;  %v187_v45 = vadd.f32 %v409_v14, %v111_v37  ;;  %v113_v46 = vmul.f32 %v405_v12, %v37_v33  ;;  %v248_v48 = vmax.f32 %v184_v40, 0.0  ;;  %v114_v51 = vmul.f32 %v403_v11, %v38_v38  ;;  %v50_v34 = vld [vmem:[%s814_s0 + $0x120] sm:$0xff]  ;;  %v52_v40 = vld [vmem:[%s814_s0 + $0x130] sm:$0xff] }
  0x1b   :  { %v249_v49 = vmax.f32 %v185_v41, 0.0  ;;  %v188_v50 = vadd.f32 %v407_v13, %v112_v42  ;;  %v302_v54 = vmax.f32 %v246_v39, %v247_v43  ;;  %v250_v55 = vmax.f32 %v186_v44, 0.0 }
  0x1c   :  { %v251_v56 = vmax.f32 %v187_v45, 0.0  ;;  %v189_v57 = vadd.f32 %v409_v14, %v113_v46  ;;  %v115_v62 = vmul.f32 %v405_v12, %v39_v47  ;;  %v190_v63 = vadd.f32 %v407_v13, %v114_v51  ;;  %v53_v45 = vld [vmem:[%s814_s0 + $0x138] sm:$0xff] }
  0x1d   :  { %v303_v60 = vmax.f32 %v248_v48, %v249_v49  ;;  %v252_v61 = vmax.f32 %v188_v50, 0.0  ;;  %334 = vst [vmem:[%s815_s3 + $0x40] sm:$0xff] %v302_v54  ;;  %v116_v3 = vmul.f32 %v403_v11, %v40_v52  ;;  %v117_v4 = vmul.f32 %v405_v12, %v41_v53  ;;  %v54_v50 = vld [vmem:[%s814_s0 + $0x140] sm:$0xff] }
  0x1e   :  { %v304_v1 = vmax.f32 %v250_v55, %v251_v56  ;;  %v253_v2 = vmax.f32 %v189_v57, 0.0  ;;  %v191_v6 = vadd.f32 %v409_v14, %v115_v62  ;;  %v254_v7 = vmax.f32 %v190_v63, 0.0 }
  0x1f   :  { %335 = vst [vmem:[%s815_s3 + $0x48] sm:$0xff] %v303_v60  ;;  %v118_v8 = vmul.f32 %v403_v11, %v42_v58  ;;  %v119_v9 = vmul.f32 %v405_v12, %v43_v59  ;;  %v192_v16 = vadd.f32 %v407_v13, %v116_v3  ;;  %v193_v17 = vadd.f32 %v409_v14, %v117_v4  ;;  %v55_v59 = vld [vmem:[%s814_s0 + $0x148] sm:$0xff] }
  0x20   :  { %336 = vst [vmem:[%s815_s3 + $0x50] sm:$0xff] %v304_v1  ;;  %v305_v15 = vmax.f32 %v252_v61, %v253_v2  ;;  %v120_v18 = vmul.f32 %v403_v11, %v44_v0  ;;  %v255_v19 = vmax.f32 %v191_v6, 0.0  ;;  %v121_v22 = vmul.f32 %v405_v12, %v45_v5  ;;  %v56_v0 = vld [vmem:[%s814_s0 + $0x150] sm:$0xff]  ;;  %v57_v1 = vld [vmem:[%s814_s0 + $0x158] sm:$0xff]  ;;  %v58_v6 = vld [vmem:[%s814_s0 + $0x160] sm:$0xff] }
  0x21   :  { %v194_v20 = vadd.f32 %v407_v13, %v118_v8  ;;  %v195_v21 = vadd.f32 %v409_v14, %v119_v9  ;;  %v256_v24 = vmax.f32 %v192_v16, 0.0  ;;  %v257_v25 = vmax.f32 %v193_v17, 0.0  ;;  %v60_v16 = vld [vmem:[%s814_s0 + $0x170] sm:$0xff] }
  0x22   :  { %337 = vst [vmem:[%s815_s3 + $0x58] sm:$0xff] %v305_v15  ;;  %v196_v26 = vadd.f32 %v407_v13, %v120_v18  ;;  %v122_v27 = vmul.f32 %v403_v11, %v46_v10  ;;  %v306_v30 = vmax.f32 %v254_v7, %v255_v19  ;;  %v197_v33 = vadd.f32 %v409_v14, %v121_v22  ;;  %v59_v7 = vld [vmem:[%s814_s0 + $0x168] sm:$0xff] }
  0x23   :  { %v258_v31 = vmax.f32 %v194_v20, 0.0  ;;  %v259_v32 = vmax.f32 %v195_v21, 0.0  ;;  %v307_v36 = vmax.f32 %v256_v24, %v257_v25  ;;  %v123_v38 = vmul.f32 %v405_v12, %v47_v23  ;;  %v61_v21 = vld [vmem:[%s814_s0 + $0x178] sm:$0xff] }
  0x24   :  { %v260_v37 = vmax.f32 %v196_v26, 0.0  ;;  %v198_v39 = vadd.f32 %v407_v13, %v122_v27  ;;  %338 = vst [vmem:[%s815_s3 + $0x60] sm:$0xff] %v306_v30  ;;  %v261_v42 = vmax.f32 %v197_v33, 0.0  ;;  %v124_v43 = vmul.f32 %v403_v11, %v48_v28  ;;  %v62_v26 = vld [vmem:[%s814_s0 + $0x180] sm:$0xff] }
  0x25   :  { %v308_v41 = vmax.f32 %v258_v31, %v259_v32  ;;  %v125_v44 = vmul.f32 %v405_v12, %v49_v29  ;;  %339 = vst [vmem:[%s815_s3 + $0x68] sm:$0xff] %v307_v36  ;;  %v199_v46 = vadd.f32 %v409_v14, %v123_v38  ;;  %v126_v48 = vmul.f32 %v403_v11, %v50_v34 }
  0x26   :  { %v262_v47 = vmax.f32 %v198_v39, 0.0  ;;  %v127_v49 = vmul.f32 %v405_v12, %v51_v35  ;;  %v309_v51 = vmax.f32 %v260_v37, %v261_v42  ;;  %v200_v52 = vadd.f32 %v407_v13, %v124_v43  ;;  %v63_v35 = vld [vmem:[%s814_s0 + $0x188] sm:$0xff] }
  0x27   :  { %340 = vst [vmem:[%s815_s3 + $0x70] sm:$0xff] %v308_v41  ;;  %v201_v53 = vadd.f32 %v409_v14, %v125_v44  ;;  %v128_v54 = vmul.f32 %v403_v11, %v52_v40  ;;  %v263_v55 = vmax.f32 %v199_v46, 0.0  ;;  %v202_v56 = vadd.f32 %v407_v13, %v126_v48  ;;  %v64_v40 = vld [vmem:[%s814_s0 + $0x190] sm:$0xff]  ;;  %v65_v41 = vld [vmem:[%s814_s0 + $0x198] sm:$0xff]  ;;  %v66_v46 = vld [vmem:[%s814_s0 + $0x1a0] sm:$0xff] }
  0x28   :  { %v203_v57 = vadd.f32 %v409_v14, %v127_v49  ;;  %v129_v58 = vmul.f32 %v405_v12, %v53_v45  ;;  %341 = vst [vmem:[%s815_s3 + $0x78] sm:$0xff] %v309_v51  ;;  %v264_v60 = vmax.f32 %v200_v52, 0.0  ;;  %v130_v63 = vmul.f32 %v403_v11, %v54_v50  ;;  %v68_v52 = vld [vmem:[%s814_s0 + $0x1b0] sm:$0xff] }
  0x29   :  { %v265_v61 = vmax.f32 %v201_v53, 0.0  ;;  %v204_v62 = vadd.f32 %v407_v13, %v128_v54  ;;  %v310_v2 = vmax.f32 %v262_v47, %v263_v55  ;;  %v266_v3 = vmax.f32 %v202_v56, 0.0  ;;  %v67_v47 = vld [vmem:[%s814_s0 + $0x1a8] sm:$0xff] }
  0x2a   :  { %v267_v4 = vmax.f32 %v203_v57, 0.0  ;;  %v205_v5 = vadd.f32 %v409_v14, %v129_v58  ;;  %v131_v10 = vmul.f32 %v405_v12, %v55_v59  ;;  %v206_v15 = vadd.f32 %v407_v13, %v130_v63  ;;  %v69_v57 = vld [vmem:[%s814_s0 + $0x1b8] sm:$0xff] }
  0x2b   :  { %v311_v8 = vmax.f32 %v264_v60, %v265_v61  ;;  %v268_v9 = vmax.f32 %v204_v62, 0.0  ;;  %342 = vst [vmem:[%s815_s3 + $0x80] sm:$0xff] %v310_v2  ;;  %v132_v19 = vmul.f32 %v403_v11, %v56_v0  ;;  %v133_v20 = vmul.f32 %v405_v12, %v57_v1  ;;  %v70_v62 = vld [vmem:[%s814_s0 + $0x1c0] sm:$0xff] }
  0x2c   :  { %v312_v17 = vmax.f32 %v266_v3, %v267_v4  ;;  %v269_v18 = vmax.f32 %v205_v5, 0.0  ;;  %v207_v22 = vadd.f32 %v409_v14, %v131_v10  ;;  %v270_v23 = vmax.f32 %v206_v15, 0.0 }
  0x2d   :  { %343 = vst [vmem:[%s815_s3 + $0x88] sm:$0xff] %v311_v8  ;;  %v134_v24 = vmul.f32 %v403_v11, %v58_v6  ;;  %v135_v25 = vmul.f32 %v405_v12, %v59_v7  ;;  %v208_v28 = vadd.f32 %v407_v13, %v132_v19  ;;  %v209_v29 = vadd.f32 %v409_v14, %v133_v20  ;;  %v71_v7 = vld [vmem:[%s814_s0 + $0x1c8] sm:$0xff] }
  0x2e   :  { %344 = vst [vmem:[%s815_s3 + $0x90] sm:$0xff] %v312_v17  ;;  %v313_v27 = vmax.f32 %v268_v9, %v269_v18  ;;  %v136_v30 = vmul.f32 %v403_v11, %v60_v16  ;;  %v271_v31 = vmax.f32 %v207_v22, 0.0  ;;  %v137_v34 = vmul.f32 %v405_v12, %v61_v21  ;;  %v72_v16 = vld [vmem:[%s814_s0 + $0x1d0] sm:$0xff]  ;;  %v73_v17 = vld [vmem:[%s814_s0 + $0x1d8] sm:$0xff]  ;;  %v74_v22 = vld [vmem:[%s814_s0 + $0x1e0] sm:$0xff] }
  0x2f   :  { %v210_v32 = vadd.f32 %v407_v13, %v134_v24  ;;  %v211_v33 = vadd.f32 %v409_v14, %v135_v25  ;;  %v272_v36 = vmax.f32 %v208_v28, 0.0  ;;  %v273_v37 = vmax.f32 %v209_v29, 0.0  ;;  %v76_v28 = vld [vmem:[%s814_s0 + $0x1f0] sm:$0xff] }
  0x30   :  { %345 = vst [vmem:[%s815_s3 + $0x98] sm:$0xff] %v313_v27  ;;  %v212_v38 = vadd.f32 %v407_v13, %v136_v30  ;;  %v138_v39 = vmul.f32 %v403_v11, %v62_v26  ;;  %v314_v42 = vmax.f32 %v270_v23, %v271_v31  ;;  %v213_v45 = vadd.f32 %v409_v14, %v137_v34  ;;  %v75_v23 = vld [vmem:[%s814_s0 + $0x1e8] sm:$0xff] }
  0x31   :  { %v274_v43 = vmax.f32 %v210_v32, 0.0  ;;  %v275_v44 = vmax.f32 %v211_v33, 0.0  ;;  %v315_v48 = vmax.f32 %v272_v36, %v273_v37  ;;  %v139_v50 = vmul.f32 %v405_v12, %v63_v35  ;;  %v77_v33 = vld [vmem:[%s814_s0 + $0x1f8] sm:$0xff] }
  0x32   :  { %v276_v49 = vmax.f32 %v212_v38, 0.0  ;;  %v214_v51 = vadd.f32 %v407_v13, %v138_v39  ;;  %346 = vst [vmem:[%s815_s3 + $0xa0] sm:$0xff] %v314_v42  ;;  %v277_v54 = vmax.f32 %v213_v45, 0.0  ;;  %v140_v55 = vmul.f32 %v403_v11, %v64_v40 }
  0x33   :  { %v316_v53 = vmax.f32 %v274_v43, %v275_v44  ;;  %v141_v56 = vmul.f32 %v405_v12, %v65_v41  ;;  %347 = vst [vmem:[%s815_s3 + $0xa8] sm:$0xff] %v315_v48  ;;  %v215_v58 = vadd.f32 %v409_v14, %v139_v50  ;;  %v142_v60 = vmul.f32 %v403_v11, %v66_v46 }
  0x34   :  { %v278_v59 = vmax.f32 %v214_v51, 0.0  ;;  %v143_v61 = vmul.f32 %v405_v12, %v67_v47  ;;  %v317_v63 = vmax.f32 %v276_v49, %v277_v54  ;;  %v216_v0 = vadd.f32 %v407_v13, %v140_v55 }
  0x35   :  { %348 = vst [vmem:[%s815_s3 + $0xb0] sm:$0xff] %v316_v53  ;;  %v217_v1 = vadd.f32 %v409_v14, %v141_v56  ;;  %v144_v2 = vmul.f32 %v403_v11, %v68_v52  ;;  %v279_v3 = vmax.f32 %v215_v58, 0.0  ;;  %v218_v4 = vadd.f32 %v407_v13, %v142_v60 }
  0x36   :  { %v219_v5 = vadd.f32 %v409_v14, %v143_v61  ;;  %v145_v6 = vmul.f32 %v405_v12, %v69_v57  ;;  %349 = vst [vmem:[%s815_s3 + $0xb8] sm:$0xff] %v317_v63  ;;  %v280_v8 = vmax.f32 %v216_v0, 0.0  ;;  %v146_v15 = vmul.f32 %v403_v11, %v70_v62 }
  0x37   :  { %v281_v9 = vmax.f32 %v217_v1, 0.0  ;;  %v220_v10 = vadd.f32 %v407_v13, %v144_v2  ;;  %v318_v18 = vmax.f32 %v278_v59, %v279_v3  ;;  %v282_v19 = vmax.f32 %v218_v4, 0.0 }
  0x38   :  { %v283_v20 = vmax.f32 %v219_v5, 0.0  ;;  %v221_v21 = vadd.f32 %v409_v14, %v145_v6  ;;  %v147_v26 = vmul.f32 %v405_v12, %v71_v7  ;;  %v222_v27 = vadd.f32 %v407_v13, %v146_v15 }
  0x39   :  { %v319_v24 = vmax.f32 %v280_v8, %v281_v9  ;;  %v284_v25 = vmax.f32 %v220_v10, 0.0  ;;  %350 = vst [vmem:[%s815_s3 + $0xc0] sm:$0xff] %v318_v18  ;;  %v148_v31 = vmul.f32 %v403_v11, %v72_v16  ;;  %v149_v32 = vmul.f32 %v405_v12, %v73_v17 }
  0x3a   :  { %v320_v29 = vmax.f32 %v282_v19, %v283_v20  ;;  %v285_v30 = vmax.f32 %v221_v21, 0.0  ;;  %v223_v34 = vadd.f32 %v409_v14, %v147_v26  ;;  %v286_v35 = vmax.f32 %v222_v27, 0.0 }
  0x3b   :  { %351 = vst [vmem:[%s815_s3 + $0xc8] sm:$0xff] %v319_v24  ;;  %v150_v36 = vmul.f32 %v403_v11, %v74_v22  ;;  %v151_v37 = vmul.f32 %v405_v12, %v75_v23  ;;  %v224_v39 = vadd.f32 %v407_v13, %v148_v31  ;;  %v225_v40 = vadd.f32 %v409_v14, %v149_v32 }
  0x3c   :  { %352 = vst [vmem:[%s815_s3 + $0xd0] sm:$0xff] %v320_v29  ;;  %v321_v38 = vmax.f32 %v284_v25, %v285_v30  ;;  %v152_v41 = vmul.f32 %v403_v11, %v76_v28  ;;  %v287_v42 = vmax.f32 %v223_v34, 0.0  ;;  %v153_v45 = vmul.f32 %v405_v12, %v77_v33 }
  0x3d   :  { %v226_v43 = vadd.f32 %v407_v13, %v150_v36  ;;  %v227_v44 = vadd.f32 %v409_v14, %v151_v37  ;;  %v288_v46 = vmax.f32 %v224_v39, 0.0  ;;  %v289_v47 = vmax.f32 %v225_v40, 0.0 }
  0x3e   :  { %353 = vst [vmem:[%s815_s3 + $0xd8] sm:$0xff] %v321_v38  ;;  %v228_v48 = vadd.f32 %v407_v13, %v152_v41  ;;  %v322_v49 = vmax.f32 %v286_v35, %v287_v42  ;;  %v229_v11 = vadd.f32 %v409_v14, %v153_v45 }
  0x3f   :  { %v290_v50 = vmax.f32 %v226_v43, 0.0  ;;  %v291_v51 = vmax.f32 %v227_v44, 0.0  ;;  %v323_v52 = vmax.f32 %v288_v46, %v289_v47 }
  0x40   :  { %v292_v53 = vmax.f32 %v228_v48, 0.0  ;;  %354 = vst [vmem:[%s815_s3 + $0xe0] sm:$0xff] %v322_v49  ;;  %v293_v54 = vmax.f32 %v229_v11, 0.0 }
  0x41   :  { %v324_v12 = vmax.f32 %v290_v50, %v291_v51  ;;  %355 = vst [vmem:[%s815_s3 + $0xe8] sm:$0xff] %v323_v52 }
  0x42   :  { %v325_v13 = vmax.f32 %v292_v53, %v293_v54 }
  0x43   :  { %356 = vst [vmem:[%s815_s3 + $0xf0] sm:$0xff] %v324_v12 }
  0x44   :  { %357 = vst [vmem:[%s815_s3 + $0xf8] sm:$0xff] %v325_v13 }

// kernel: cnn_forward.7
= control target key start
LH: loop header
LB: loop body
LE: loop exit
PB: predicated region body
PF: predicated region fallthrough
CT: control target
= control target key end

     0   :  { %vm92_vm0 = vcmask 261120   ;;  %s1956_s1 = inlined_call_operand.vmem [shape: f32[32,128], index: 1, kind: input, shape index: {}]   ;;  %s1957_s0 = inlined_call_operand.vmem [shape: f32[512,32], index: 0, kind: input, shape index: {}]   ;;  %s1958_s2 = inlined_call_operand.vmem [shape: f32[1,128], index: 2, kind: input, shape index: {}]   ;;  %s1959_s3 = inlined_call_operand.vmem [shape: f32[512,128], index: 3, kind: output, shape index: {0}]   ;;  %s1960_s4 = inlined_call_operand.vmem [shape: f32[8,128], index: 4, kind: output, shape index: {1}]   ;;  %s1961_s5 = inlined_call_operand.vmem [shape: f32[8,128], index: 5, kind: output, shape index: {2}]  }
   0x1   :  { %v81_v0 = vld [vmem:[%s1956_s1] sm:$0xff]  ;;  %v82_v1 = vld [vmem:[%s1956_s1 + $0x8] sm:$0xff]  ;;  %v83_v2 = vld [vmem:[%s1956_s1 + $0x10] sm:$0xff] }
   0x2   :  { %v1187_v3 = vpack.c.bf16 %v82_v1, %v81_v0  ;;  %v84_v4 = vld [vmem:[%s1956_s1 + $0x18] sm:$0xff]  ;;  %v17_v5 = vld [vmem:[%s1957_s0] sm:$0xff]  ;;  %v18_v7 = vld [vmem:[%s1957_s0 + $0x8] sm:$0xff] }
   0x3   :  { %v1191_v6 = vpack.c.bf16 %v84_v4, %v83_v2  ;;  %1091 = vmatprep.mubr.msk.f32.mxu0 %vm92_vm0, %v17_v5  ;;  %v19_v8 = vld [vmem:[%s1957_s0 + $0x10] sm:$0xff]  ;;  %v20_v9 = vld [vmem:[%s1957_s0 + $0x18] sm:$0xff]  ;;  %v49_v10 = vld [vmem:[%s1957_s0 + $0x100] sm:$0xff] }
   0x4   :  { %1188 = vmatprep.subr.bf16.mxu0 %v1187_v3  ;;  %1195 = vmatprep.subr.bf16.mxu1 %v1187_v3  ;;  %v50_v11 = vld [vmem:[%s1957_s0 + $0x108] sm:$0xff]  ;;  %v51_v12 = vld [vmem:[%s1957_s0 + $0x110] sm:$0xff]  ;;  %v21_v13 = vld [vmem:[%s1957_s0 + $0x20] sm:$0xff] }
   0x5   :  { %1190 = vmatpush3.bf16.msra.mxu0 %v1187_v3  ;;  %1197 = vmatpush3.bf16.msra.mxu1 %v1187_v3  ;;  %v52_v14 = vld [vmem:[%s1957_s0 + $0x118] sm:$0xff]  ;;  %v22_v15 = vld [vmem:[%s1957_s0 + $0x28] sm:$0xff]  ;;  %v53_v16 = vld [vmem:[%s1957_s0 + $0x120] sm:$0xff] }
   0x6   :  { %1192 = vmatprep.subr.bf16.mxu0 %v1191_v6  ;;  %1196 = vmatprep.subr.bf16.mxu1 %v1191_v6  ;;  %v23_v17 = vld [vmem:[%s1957_s0 + $0x30] sm:$0xff]  ;;  %v54_v18 = vld [vmem:[%s1957_s0 + $0x128] sm:$0xff]  ;;  %v24_v19 = vld [vmem:[%s1957_s0 + $0x38] sm:$0xff] }
   0x7   :  { %1139 = vmatprep.mubr.msk.f32.mxu1 %vm92_vm0, %v49_v10  ;;  %v55_v20 = vld [vmem:[%s1957_s0 + $0x130] sm:$0xff]  ;;  %v25_v21 = vld [vmem:[%s1957_s0 + $0x40] sm:$0xff]  ;;  %v56_v22 = vld [vmem:[%s1957_s0 + $0x138] sm:$0xff] }
   0x8   :  { %v26_v23 = vld [vmem:[%s1957_s0 + $0x48] sm:$0xff]  ;;  %v57_v24 = vld [vmem:[%s1957_s0 + $0x140] sm:$0xff]  ;;  %v27_v25 = vld [vmem:[%s1957_s0 + $0x50] sm:$0xff] }
   0x9   :  { %1194 = vmatpush3.bf16.msra.mxu0 %v1191_v6  ;;  %1198 = vmatpush3.bf16.msra.mxu1 %v1191_v6  ;;  %v58_v26 = vld [vmem:[%s1957_s0 + $0x148] sm:$0xff]  ;;  %v28_v27 = vld [vmem:[%s1957_s0 + $0x58] sm:$0xff]  ;;  %v59_v28 = vld [vmem:[%s1957_s0 + $0x150] sm:$0xff] }
   0xa   :  { %v29_v29 = vld [vmem:[%s1957_s0 + $0x60] sm:$0xff]  ;;  %v60_v30 = vld [vmem:[%s1957_s0 + $0x158] sm:$0xff]  ;;  %v30_v31 = vld [vmem:[%s1957_s0 + $0x68] sm:$0xff] }
   0xb   :  { %v61_v32 = vld [vmem:[%s1957_s0 + $0x160] sm:$0xff]  ;;  %v31_v33 = vld [vmem:[%s1957_s0 + $0x70] sm:$0xff]  ;;  %v62_v34 = vld [vmem:[%s1957_s0 + $0x168] sm:$0xff] }
   0xc   :  { %1092 = vmatmul.mubr.msk.f32.vlgmr.msra.gmra.mrb[0].mxu0 %vm92_vm0, %v18_v7  ;;  %1140 = vmatmul.mubr.msk.f32.vlgmr.msra.gmra.mrb[0].mxu1 %vm92_vm0, %v50_v11  ;;  %v32_v35 = vld [vmem:[%s1957_s0 + $0x78] sm:$0xff]  ;;  %v63_v36 = vld [vmem:[%s1957_s0 + $0x170] sm:$0xff]  ;;  %v33_v37 = vld [vmem:[%s1957_s0 + $0x80] sm:$0xff] }
   0xd   :  { %1094 = vmatprep.mubr.msk.f32.mxu0 %vm92_vm0, %v19_v8  ;;  %1142 = vmatprep.mubr.msk.f32.mxu1 %vm92_vm0, %v51_v12  ;;  %v64_v38 = vld [vmem:[%s1957_s0 + $0x178] sm:$0xff]  ;;  %v34_v39 = vld [vmem:[%s1957_s0 + $0x88] sm:$0xff]  ;;  %v65_v40 = vld [vmem:[%s1957_s0 + $0x180] sm:$0xff] }
   0xe   :  { %v35_v41 = vld [vmem:[%s1957_s0 + $0x90] sm:$0xff]  ;;  %v66_v42 = vld [vmem:[%s1957_s0 + $0x188] sm:$0xff]  ;;  %v36_v43 = vld [vmem:[%s1957_s0 + $0x98] sm:$0xff] }
   0xf   :  { %v67_v44 = vld [vmem:[%s1957_s0 + $0x190] sm:$0xff]  ;;  %v37_v45 = vld [vmem:[%s1957_s0 + $0xa0] sm:$0xff]  ;;  %v68_v46 = vld [vmem:[%s1957_s0 + $0x198] sm:$0xff] }
  0x10   :  { %1095 = vmatmul.mubr.msk.f32.gmra.mrb[2].mxu0 %vm92_vm0, %v20_v9  ;;  %1143 = vmatmul.mubr.msk.f32.gmra.mrb[2].mxu1 %vm92_vm0, %v52_v14  ;;  %v38_v47 = vld [vmem:[%s1957_s0 + $0xa8] sm:$0xff]  ;;  %v69_v48 = vld [vmem:[%s1957_s0 + $0x1a0] sm:$0xff]  ;;  %v39_v49 = vld [vmem:[%s1957_s0 + $0xb0] sm:$0xff] }
  0x11   :  { %1097 = vmatprep.mubr.msk.f32.mxu0 %vm92_vm0, %v21_v13  ;;  %1145 = vmatprep.mubr.msk.f32.mxu1 %vm92_vm0, %v53_v16  ;;  %v70_v50 = vld [vmem:[%s1957_s0 + $0x1a8] sm:$0xff]  ;;  %v40_v51 = vld [vmem:[%s1957_s0 + $0xb8] sm:$0xff]  ;;  %v71_v52 = vld [vmem:[%s1957_s0 + $0x1b0] sm:$0xff] }
  0x12   :  { %v41_v53 = vld [vmem:[%s1957_s0 + $0xc0] sm:$0xff]  ;;  %v72_v54 = vld [vmem:[%s1957_s0 + $0x1b8] sm:$0xff]  ;;  %v42_v55 = vld [vmem:[%s1957_s0 + $0xc8] sm:$0xff] }
  0x13   :  { %v73_v56 = vld [vmem:[%s1957_s0 + $0x1c0] sm:$0xff]  ;;  %v43_v57 = vld [vmem:[%s1957_s0 + $0xd0] sm:$0xff]  ;;  %v74_v58 = vld [vmem:[%s1957_s0 + $0x1c8] sm:$0xff] }
  0x14   :  { %1098 = vmatmul.mubr.msk.f32.gmra.mrb[4].mxu0 %vm92_vm0, %v22_v15  ;;  %1146 = vmatmul.mubr.msk.f32.gmra.mrb[4].mxu1 %vm92_vm0, %v54_v18  ;;  %v44_v59 = vld [vmem:[%s1957_s0 + $0xd8] sm:$0xff]  ;;  %v75_v60 = vld [vmem:[%s1957_s0 + $0x1d0] sm:$0xff]  ;;  %v45_v61 = vld [vmem:[%s1957_s0 + $0xe0] sm:$0xff] }
  0x15   :  { %1100 = vmatprep.mubr.msk.f32.mxu0 %vm92_vm0, %v23_v17  ;;  %1148 = vmatprep.mubr.msk.f32.mxu1 %vm92_vm0, %v55_v20  ;;  %v76_v62 = vld [vmem:[%s1957_s0 + $0x1d8] sm:$0xff]  ;;  %v46_v63 = vld [vmem:[%s1957_s0 + $0xe8] sm:$0xff]  ;;  %v77_v0 = vld [vmem:[%s1957_s0 + $0x1e0] sm:$0xff] }
  0x16   :  { %v47_v1 = vld [vmem:[%s1957_s0 + $0xf0] sm:$0xff]  ;;  %v78_v2 = vld [vmem:[%s1957_s0 + $0x1e8] sm:$0xff]  ;;  %v48_v3 = vld [vmem:[%s1957_s0 + $0xf8] sm:$0xff] }
  0x17   :  { %v79_v4 = vld [vmem:[%s1957_s0 + $0x1f0] sm:$0xff]  ;;  %v80_v5 = vld [vmem:[%s1957_s0 + $0x1f8] sm:$0xff]  ;;  %v1500_v6 = vld [vmem:[%s1958_s2] ss:$0 sm:$0xff] }
  0x18   :  { %1101 = vmatmul.mubr.msk.f32.gmra.mrb[6].mxu0 %vm92_vm0, %v24_v19  ;;  %1149 = vmatmul.mubr.msk.f32.gmra.mrb[6].mxu1 %vm92_vm0, %v56_v22 }
  0x19   :  { %1103 = vmatprep.mubr.msk.f32.mxu0 %vm92_vm0, %v25_v21  ;;  %1151 = vmatprep.mubr.msk.f32.mxu1 %vm92_vm0, %v57_v24 }
  0x1c   :  { %1104 = vmatmul.mubr.msk.f32.gmra.mrb[8].mxu0 %vm92_vm0, %v26_v23  ;;  %1152 = vmatmul.mubr.msk.f32.gmra.mrb[8].mxu1 %vm92_vm0, %v58_v26 }
  0x1d   :  { %1106 = vmatprep.mubr.msk.f32.mxu0 %vm92_vm0, %v27_v25  ;;  %1154 = vmatprep.mubr.msk.f32.mxu1 %vm92_vm0, %v59_v28 }
  0x20   :  { %1107 = vmatmul.mubr.msk.f32.gmra.mrb[10].mxu0 %vm92_vm0, %v28_v27  ;;  %1155 = vmatmul.mubr.msk.f32.gmra.mrb[10].mxu1 %vm92_vm0, %v60_v30 }
  0x21   :  { %1109 = vmatprep.mubr.msk.f32.mxu0 %vm92_vm0, %v29_v29  ;;  %1157 = vmatprep.mubr.msk.f32.mxu1 %vm92_vm0, %v61_v32 }
  0x24   :  { %1110 = vmatmul.mubr.msk.f32.gmra.mrb[12].mxu0 %vm92_vm0, %v30_v31  ;;  %1158 = vmatmul.mubr.msk.f32.gmra.mrb[12].mxu1 %vm92_vm0, %v62_v34 }
  0x25   :  { %1112 = vmatprep.mubr.msk.f32.mxu0 %vm92_vm0, %v31_v33  ;;  %1160 = vmatprep.mubr.msk.f32.mxu1 %vm92_vm0, %v63_v36 }
  0x28   :  { %1113 = vmatmul.mubr.msk.f32.gmra.mrb[14].mxu0 %vm92_vm0, %v32_v35  ;;  %1161 = vmatmul.mubr.msk.f32.gmra.mrb[14].mxu1 %vm92_vm0, %v64_v38 }
  0x29   :  { %1115 = vmatprep.mubr.msk.f32.mxu0 %vm92_vm0, %v33_v37  ;;  %1163 = vmatprep.mubr.msk.f32.mxu1 %vm92_vm0, %v65_v40 }
  0x2c   :  { %1116 = vmatmul.mubr.msk.f32.gmra.mrb[16].mxu0 %vm92_vm0, %v34_v39  ;;  %1164 = vmatmul.mubr.msk.f32.gmra.mrb[16].mxu1 %vm92_vm0, %v66_v42 }
  0x2d   :  { %1118 = vmatprep.mubr.msk.f32.mxu0 %vm92_vm0, %v35_v41  ;;  %1166 = vmatprep.mubr.msk.f32.mxu1 %vm92_vm0, %v67_v44 }
  0x30   :  { %1119 = vmatmul.mubr.msk.f32.gmra.mrb[18].mxu0 %vm92_vm0, %v36_v43  ;;  %1167 = vmatmul.mubr.msk.f32.gmra.mrb[18].mxu1 %vm92_vm0, %v68_v46 }
  0x31   :  { %1121 = vmatprep.mubr.msk.f32.mxu0 %vm92_vm0, %v37_v45  ;;  %1169 = vmatprep.mubr.msk.f32.mxu1 %vm92_vm0, %v69_v48 }
  0x34   :  { %1122 = vmatmul.mubr.msk.f32.gmra.mrb[20].mxu0 %vm92_vm0, %v38_v47  ;;  %1170 = vmatmul.mubr.msk.f32.gmra.mrb[20].mxu1 %vm92_vm0, %v70_v50 }
  0x35   :  { %1124 = vmatprep.mubr.msk.f32.mxu0 %vm92_vm0, %v39_v49  ;;  %1172 = vmatprep.mubr.msk.f32.mxu1 %vm92_vm0, %v71_v52 }
  0x38   :  { %1125 = vmatmul.mubr.msk.f32.gmra.mrb[22].mxu0 %vm92_vm0, %v40_v51  ;;  %1173 = vmatmul.mubr.msk.f32.gmra.mrb[22].mxu1 %vm92_vm0, %v72_v54 }
  0x39   :  { %1127 = vmatprep.mubr.msk.f32.mxu0 %vm92_vm0, %v41_v53  ;;  %1175 = vmatprep.mubr.msk.f32.mxu1 %vm92_vm0, %v73_v56 }
  0x3c   :  { %1128 = vmatmul.mubr.msk.f32.gmra.mrb[24].mxu0 %vm92_vm0, %v42_v55  ;;  %1176 = vmatmul.mubr.msk.f32.gmra.mrb[24].mxu1 %vm92_vm0, %v74_v58 }
  0x3d   :  { %1130 = vmatprep.mubr.msk.f32.mxu0 %vm92_vm0, %v43_v57  ;;  %1178 = vmatprep.mubr.msk.f32.mxu1 %vm92_vm0, %v75_v60 }
  0x40   :  { %1131 = vmatmul.mubr.msk.f32.gmra.mrb[26].mxu0 %vm92_vm0, %v44_v59  ;;  %1179 = vmatmul.mubr.msk.f32.gmra.mrb[26].mxu1 %vm92_vm0, %v76_v62 }
  0x41   :  { %1133 = vmatprep.mubr.msk.f32.mxu0 %vm92_vm0, %v45_v61  ;;  %1181 = vmatprep.mubr.msk.f32.mxu1 %vm92_vm0, %v77_v0 }
  0x44   :  { %1134 = vmatmul.mubr.msk.f32.gmra.mrb[28].mxu0 %vm92_vm0, %v46_v63  ;;  %1182 = vmatmul.mubr.msk.f32.gmra.mrb[28].mxu1 %vm92_vm0, %v78_v2 }
  0x45   :  { %1136 = vmatprep.mubr.msk.f32.mxu0 %vm92_vm0, %v47_v1  ;;  %1184 = vmatprep.mubr.msk.f32.mxu1 %vm92_vm0, %v79_v4 }
  0x48   :  { %1137 = vmatmul.mubr.msk.f32.gmra.mrb[30].mxu0 %vm92_vm0, %v48_v3  ;;  %1185 = vmatmul.mubr.msk.f32.gmra.mrb[30].mxu1 %vm92_vm0, %v80_v5 }
  0xdf   :  { %v1093_v7 = vpop.f32.mrb[0].mxu0  ;;  %v1141_v12 = vpop.f32.mrb[0].mxu1 }
  0xe0   :  { %v357_v8 = vadd.f32 %v1093_v7, %v1500_v6  ;;  %v351_v9 = vpop.f32.mrb[1].mxu0  ;;  %v1511_v16 = vadd.f32 %v1141_v12, %v1500_v6  ;;  %v511_v17 = vpop.f32.mrb[1].mxu1 }
  0xe1   :  { %v352_v10 = vadd.f32 %v1500_v6, %v351_v9  ;;  %v1515_v20 = vadd.f32 %v1500_v6, %v511_v17 }
  0xe2   :  { %671 = vst [vmem:[%s1959_s3 + $0x8] sm:$0xff] %v357_v8  ;;  %v805_v11 = vmul.f32 %v357_v8, %v357_v8  ;;  %703 = vst [vmem:[%s1959_s3 + $0x108] sm:$0xff] %v1511_v16 }
  0xe3   :  { %670 = vst [vmem:[%s1959_s3] sm:$0xff] %v352_v10  ;;  %v734_v13 = vadd.f32 %v357_v8, %v352_v10  ;;  %v804_v14 = vmul.f32 %v352_v10, %v352_v10  ;;  %v1096_v15 = vpop.f32.mrb[2].mxu0  ;;  %702 = vst [vmem:[%s1959_s3 + $0x100] sm:$0xff] %v1515_v20  ;;  %v1144_v23 = vpop.f32.mrb[2].mxu1 }
  0xe4   :  { %v367_v18 = vadd.f32 %v1096_v15, %v1500_v6  ;;  %v361_v19 = vpop.f32.mrb[3].mxu0  ;;  %v1533_v27 = vadd.f32 %v1144_v23, %v1500_v6  ;;  %v521_v28 = vpop.f32.mrb[3].mxu1 }
  0xe5   :  { %v868_v21 = vadd.f32 %v805_v11, %v804_v14  ;;  %v362_v22 = vadd.f32 %v1500_v6, %v361_v19  ;;  %v1537_v31 = vadd.f32 %v1500_v6, %v521_v28 }
  0xe6   :  { %673 = vst [vmem:[%s1959_s3 + $0x18] sm:$0xff] %v367_v18  ;;  %v807_v32 = vmul.f32 %v367_v18, %v367_v18  ;;  %705 = vst [vmem:[%s1959_s3 + $0x118] sm:$0xff] %v1533_v27 }
  0xe7   :  { %672 = vst [vmem:[%s1959_s3 + $0x10] sm:$0xff] %v362_v22  ;;  %v735_v24 = vadd.f32 %v734_v13, %v362_v22  ;;  %v806_v25 = vmul.f32 %v362_v22, %v362_v22  ;;  %v1099_v26 = vpop.f32.mrb[4].mxu0  ;;  %704 = vst [vmem:[%s1959_s3 + $0x110] sm:$0xff] %v1537_v31  ;;  %v1147_v36 = vpop.f32.mrb[4].mxu1 }
  0xe8   :  { %v377_v29 = vadd.f32 %v1099_v26, %v1500_v6  ;;  %v371_v30 = vpop.f32.mrb[5].mxu0  ;;  %v1555_v41 = vadd.f32 %v1147_v36, %v1500_v6  ;;  %v531_v42 = vpop.f32.mrb[5].mxu1 }
  0xe9   :  { %v869_v33 = vadd.f32 %v868_v21, %v806_v25  ;;  %v372_v34 = vadd.f32 %v1500_v6, %v371_v30  ;;  %v736_v35 = vadd.f32 %v735_v24, %v367_v18  ;;  %v1559_v45 = vadd.f32 %v1500_v6, %v531_v42 }
  0xea   :  { %675 = vst [vmem:[%s1959_s3 + $0x28] sm:$0xff] %v377_v29  ;;  %v809_v46 = vmul.f32 %v377_v29, %v377_v29  ;;  %707 = vst [vmem:[%s1959_s3 + $0x128] sm:$0xff] %v1555_v41 }
  0xeb   :  { %674 = vst [vmem:[%s1959_s3 + $0x20] sm:$0xff] %v372_v34  ;;  %v737_v37 = vadd.f32 %v736_v35, %v372_v34  ;;  %v808_v38 = vmul.f32 %v372_v34, %v372_v34  ;;  %v870_v39 = vadd.f32 %v869_v33, %v807_v32  ;;  %v1102_v40 = vpop.f32.mrb[6].mxu0  ;;  %706 = vst [vmem:[%s1959_s3 + $0x120] sm:$0xff] %v1559_v45  ;;  %v1150_v50 = vpop.f32.mrb[6].mxu1 }
  0xec   :  { %v387_v43 = vadd.f32 %v1102_v40, %v1500_v6  ;;  %v381_v44 = vpop.f32.mrb[7].mxu0  ;;  %v1577_v55 = vadd.f32 %v1150_v50, %v1500_v6  ;;  %v541_v56 = vpop.f32.mrb[7].mxu1 }
  0xed   :  { %v871_v47 = vadd.f32 %v870_v39, %v808_v38  ;;  %v382_v48 = vadd.f32 %v1500_v6, %v381_v44  ;;  %v738_v49 = vadd.f32 %v737_v37, %v377_v29  ;;  %v1581_v59 = vadd.f32 %v1500_v6, %v541_v56 }
  0xee   :  { %677 = vst [vmem:[%s1959_s3 + $0x38] sm:$0xff] %v387_v43  ;;  %v811_v60 = vmul.f32 %v387_v43, %v387_v43  ;;  %709 = vst [vmem:[%s1959_s3 + $0x138] sm:$0xff] %v1577_v55 }
  0xef   :  { %676 = vst [vmem:[%s1959_s3 + $0x30] sm:$0xff] %v382_v48  ;;  %v739_v51 = vadd.f32 %v738_v49, %v382_v48  ;;  %v810_v52 = vmul.f32 %v382_v48, %v382_v48  ;;  %v872_v53 = vadd.f32 %v871_v47, %v809_v46  ;;  %v1105_v54 = vpop.f32.mrb[8].mxu0  ;;  %708 = vst [vmem:[%s1959_s3 + $0x130] sm:$0xff] %v1581_v59  ;;  %v1153_v0 = vpop.f32.mrb[8].mxu1 }
  0xf0   :  { %v397_v57 = vadd.f32 %v1105_v54, %v1500_v6  ;;  %v391_v58 = vpop.f32.mrb[9].mxu0  ;;  %v1599_v5 = vadd.f32 %v1153_v0, %v1500_v6  ;;  %v551_v7 = vpop.f32.mrb[9].mxu1 }
  0xf1   :  { %v873_v61 = vadd.f32 %v872_v53, %v810_v52  ;;  %v392_v62 = vadd.f32 %v1500_v6, %v391_v58  ;;  %v740_v63 = vadd.f32 %v739_v51, %v387_v43  ;;  %v1603_v10 = vadd.f32 %v1500_v6, %v551_v7 }
  0xf2   :  { %679 = vst [vmem:[%s1959_s3 + $0x48] sm:$0xff] %v397_v57  ;;  %v813_v11 = vmul.f32 %v397_v57, %v397_v57  ;;  %711 = vst [vmem:[%s1959_s3 + $0x148] sm:$0xff] %v1599_v5 }
  0xf3   :  { %678 = vst [vmem:[%s1959_s3 + $0x40] sm:$0xff] %v392_v62  ;;  %v741_v1 = vadd.f32 %v740_v63, %v392_v62  ;;  %v812_v2 = vmul.f32 %v392_v62, %v392_v62  ;;  %v874_v3 = vadd.f32 %v873_v61, %v811_v60  ;;  %v1108_v4 = vpop.f32.mrb[10].mxu0  ;;  %710 = vst [vmem:[%s1959_s3 + $0x140] sm:$0xff] %v1603_v10  ;;  %v1156_v15 = vpop.f32.mrb[10].mxu1 }
  0xf4   :  { %v407_v8 = vadd.f32 %v1108_v4, %v1500_v6  ;;  %v401_v9 = vpop.f32.mrb[11].mxu0  ;;  %v1621_v22 = vadd.f32 %v1156_v15, %v1500_v6  ;;  %v561_v23 = vpop.f32.mrb[11].mxu1 }
  0xf5   :  { %v875_v12 = vadd.f32 %v874_v3, %v812_v2  ;;  %v402_v13 = vadd.f32 %v1500_v6, %v401_v9  ;;  %v742_v14 = vadd.f32 %v741_v1, %v397_v57  ;;  %v1625_v26 = vadd.f32 %v1500_v6, %v561_v23 }
  0xf6   :  { %681 = vst [vmem:[%s1959_s3 + $0x58] sm:$0xff] %v407_v8  ;;  %v815_v28 = vmul.f32 %v407_v8, %v407_v8  ;;  %713 = vst [vmem:[%s1959_s3 + $0x158] sm:$0xff] %v1621_v22 }
  0xf7   :  { %680 = vst [vmem:[%s1959_s3 + $0x50] sm:$0xff] %v402_v13  ;;  %v743_v17 = vadd.f32 %v742_v14, %v402_v13  ;;  %v814_v18 = vmul.f32 %v402_v13, %v402_v13  ;;  %v876_v19 = vadd.f32 %v875_v12, %v813_v11  ;;  %v1111_v21 = vpop.f32.mrb[12].mxu0  ;;  %712 = vst [vmem:[%s1959_s3 + $0x150] sm:$0xff] %v1625_v26  ;;  %v1159_v33 = vpop.f32.mrb[12].mxu1 }
  0xf8   :  { %v417_v24 = vadd.f32 %v1111_v21, %v1500_v6  ;;  %v411_v25 = vpop.f32.mrb[13].mxu0  ;;  %v1643_v38 = vadd.f32 %v1159_v33, %v1500_v6  ;;  %v571_v39 = vpop.f32.mrb[13].mxu1 }
  0xf9   :  { %v877_v29 = vadd.f32 %v876_v19, %v814_v18  ;;  %v412_v30 = vadd.f32 %v1500_v6, %v411_v25  ;;  %v744_v32 = vadd.f32 %v743_v17, %v407_v8  ;;  %v1647_v43 = vadd.f32 %v1500_v6, %v571_v39 }
  0xfa   :  { %683 = vst [vmem:[%s1959_s3 + $0x68] sm:$0xff] %v417_v24  ;;  %v817_v44 = vmul.f32 %v417_v24, %v417_v24  ;;  %715 = vst [vmem:[%s1959_s3 + $0x168] sm:$0xff] %v1643_v38 }
  0xfb   :  { %682 = vst [vmem:[%s1959_s3 + $0x60] sm:$0xff] %v412_v30  ;;  %v745_v34 = vadd.f32 %v744_v32, %v412_v30  ;;  %v816_v35 = vmul.f32 %v412_v30, %v412_v30  ;;  %v878_v36 = vadd.f32 %v877_v29, %v815_v28  ;;  %v1114_v37 = vpop.f32.mrb[14].mxu0  ;;  %714 = vst [vmem:[%s1959_s3 + $0x160] sm:$0xff] %v1647_v43  ;;  %v1162_v49 = vpop.f32.mrb[14].mxu1 }
  0xfc   :  { %v427_v40 = vadd.f32 %v1114_v37, %v1500_v6  ;;  %v421_v42 = vpop.f32.mrb[15].mxu0  ;;  %v1665_v54 = vadd.f32 %v1162_v49, %v1500_v6  ;;  %v581_v56 = vpop.f32.mrb[15].mxu1 }
  0xfd   :  { %v879_v46 = vadd.f32 %v878_v36, %v816_v35  ;;  %v422_v47 = vadd.f32 %v1500_v6, %v421_v42  ;;  %v746_v48 = vadd.f32 %v745_v34, %v417_v24  ;;  %v1669_v60 = vadd.f32 %v1500_v6, %v581_v56 }
  0xfe   :  { %685 = vst [vmem:[%s1959_s3 + $0x78] sm:$0xff] %v427_v40  ;;  %v819_v61 = vmul.f32 %v427_v40, %v427_v40  ;;  %717 = vst [vmem:[%s1959_s3 + $0x178] sm:$0xff] %v1665_v54 }
  0xff   :  { %684 = vst [vmem:[%s1959_s3 + $0x70] sm:$0xff] %v422_v47  ;;  %v747_v50 = vadd.f32 %v746_v48, %v422_v47  ;;  %v818_v51 = vmul.f32 %v422_v47, %v422_v47  ;;  %v880_v52 = vadd.f32 %v879_v46, %v817_v44  ;;  %v1117_v53 = vpop.f32.mrb[16].mxu0  ;;  %716 = vst [vmem:[%s1959_s3 + $0x170] sm:$0xff] %v1669_v60  ;;  %v1165_v1 = vpop.f32.mrb[16].mxu1 }
 0x100   :  { %v437_v57 = vadd.f32 %v1117_v53, %v1500_v6  ;;  %v431_v58 = vpop.f32.mrb[17].mxu0  ;;  %v1687_v8 = vadd.f32 %v1165_v1, %v1500_v6  ;;  %v591_v9 = vpop.f32.mrb[17].mxu1 }
 0x101   :  { %v881_v62 = vadd.f32 %v880_v52, %v818_v51  ;;  %v432_v63 = vadd.f32 %v1500_v6, %v431_v58  ;;  %v748_v0 = vadd.f32 %v747_v50, %v427_v40  ;;  %v1691_v13 = vadd.f32 %v1500_v6, %v591_v9 }
 0x102   :  { %687 = vst [vmem:[%s1959_s3 + $0x88] sm:$0xff] %v437_v57  ;;  %v821_v14 = vmul.f32 %v437_v57, %v437_v57  ;;  %719 = vst [vmem:[%s1959_s3 + $0x188] sm:$0xff] %v1687_v8 }
 0x103   :  { %686 = vst [vmem:[%s1959_s3 + $0x80] sm:$0xff] %v432_v63  ;;  %v749_v2 = vadd.f32 %v748_v0, %v432_v63  ;;  %v820_v3 = vmul.f32 %v432_v63, %v432_v63  ;;  %v882_v4 = vadd.f32 %v881_v62, %v819_v61  ;;  %v1120_v7 = vpop.f32.mrb[18].mxu0  ;;  %718 = vst [vmem:[%s1959_s3 + $0x180] sm:$0xff] %v1691_v13  ;;  %v1168_v19 = vpop.f32.mrb[18].mxu1 }
 0x104   :  { %v447_v11 = vadd.f32 %v1120_v7, %v1500_v6  ;;  %v441_v12 = vpop.f32.mrb[19].mxu0  ;;  %v1709_v28 = vadd.f32 %v1168_v19, %v1500_v6  ;;  %v601_v29 = vpop.f32.mrb[19].mxu1 }
 0x105   :  { %v883_v15 = vadd.f32 %v882_v4, %v820_v3  ;;  %v442_v17 = vadd.f32 %v1500_v6, %v441_v12  ;;  %v750_v18 = vadd.f32 %v749_v2, %v437_v57  ;;  %v1713_v33 = vadd.f32 %v1500_v6, %v601_v29 }
 0x106   :  { %689 = vst [vmem:[%s1959_s3 + $0x98] sm:$0xff] %v447_v11  ;;  %v823_v34 = vmul.f32 %v447_v11, %v447_v11  ;;  %721 = vst [vmem:[%s1959_s3 + $0x198] sm:$0xff] %v1709_v28 }
 0x107   :  { %688 = vst [vmem:[%s1959_s3 + $0x90] sm:$0xff] %v442_v17  ;;  %v751_v21 = vadd.f32 %v750_v18, %v442_v17  ;;  %v822_v23 = vmul.f32 %v442_v17, %v442_v17  ;;  %v884_v24 = vadd.f32 %v883_v15, %v821_v14  ;;  %v1123_v25 = vpop.f32.mrb[20].mxu0  ;;  %720 = vst [vmem:[%s1959_s3 + $0x190] sm:$0xff] %v1713_v33  ;;  %v1171_v39 = vpop.f32.mrb[20].mxu1 }
 0x108   :  { %v457_v30 = vadd.f32 %v1123_v25, %v1500_v6  ;;  %v451_v32 = vpop.f32.mrb[21].mxu0  ;;  %v1731_v47 = vadd.f32 %v1171_v39, %v1500_v6  ;;  %v611_v48 = vpop.f32.mrb[21].mxu1 }
 0x109   :  { %v885_v35 = vadd.f32 %v884_v24, %v822_v23  ;;  %v452_v36 = vadd.f32 %v1500_v6, %v451_v32  ;;  %v752_v37 = vadd.f32 %v751_v21, %v447_v11  ;;  %v1735_v51 = vadd.f32 %v1500_v6, %v611_v48 }
 0x10a   :  { %691 = vst [vmem:[%s1959_s3 + $0xa8] sm:$0xff] %v457_v30  ;;  %v825_v52 = vmul.f32 %v457_v30, %v457_v30  ;;  %723 = vst [vmem:[%s1959_s3 + $0x1a8] sm:$0xff] %v1731_v47 }
 0x10b   :  { %690 = vst [vmem:[%s1959_s3 + $0xa0] sm:$0xff] %v452_v36  ;;  %v753_v40 = vadd.f32 %v752_v37, %v452_v36  ;;  %v824_v42 = vmul.f32 %v452_v36, %v452_v36  ;;  %v886_v44 = vadd.f32 %v885_v35, %v823_v34  ;;  %v1126_v46 = vpop.f32.mrb[22].mxu0  ;;  %722 = vst [vmem:[%s1959_s3 + $0x1a0] sm:$0xff] %v1735_v51  ;;  %v1174_v58 = vpop.f32.mrb[22].mxu1 }
 0x10c   :  { %v467_v49 = vadd.f32 %v1126_v46, %v1500_v6  ;;  %v461_v50 = vpop.f32.mrb[23].mxu0  ;;  %v1753_v1 = vadd.f32 %v1174_v58, %v1500_v6  ;;  %v621_v2 = vpop.f32.mrb[23].mxu1 }
 0x10d   :  { %v887_v53 = vadd.f32 %v886_v44, %v824_v42  ;;  %v462_v56 = vadd.f32 %v1500_v6, %v461_v50  ;;  %v754_v57 = vadd.f32 %v753_v40, %v457_v30  ;;  %v1757_v7 = vadd.f32 %v1500_v6, %v621_v2 }
 0x10e   :  { %693 = vst [vmem:[%s1959_s3 + $0xb8] sm:$0xff] %v467_v49  ;;  %v827_v9 = vmul.f32 %v467_v49, %v467_v49  ;;  %725 = vst [vmem:[%s1959_s3 + $0x1b8] sm:$0xff] %v1753_v1 }
 0x10f   :  { %692 = vst [vmem:[%s1959_s3 + $0xb0] sm:$0xff] %v462_v56  ;;  %v755_v61 = vadd.f32 %v754_v57, %v462_v56  ;;  %v826_v62 = vmul.f32 %v462_v56, %v462_v56  ;;  %v888_v63 = vadd.f32 %v887_v53, %v825_v52  ;;  %v1129_v0 = vpop.f32.mrb[24].mxu0  ;;  %724 = vst [vmem:[%s1959_s3 + $0x1b0] sm:$0xff] %v1757_v7  ;;  %v1177_v15 = vpop.f32.mrb[24].mxu1 }
 0x110   :  { %v477_v3 = vadd.f32 %v1129_v0, %v1500_v6  ;;  %v471_v4 = vpop.f32.mrb[25].mxu0  ;;  %v1775_v23 = vadd.f32 %v1177_v15, %v1500_v6  ;;  %v631_v24 = vpop.f32.mrb[25].mxu1 }
 0x111   :  { %v889_v11 = vadd.f32 %v888_v63, %v826_v62  ;;  %v472_v12 = vadd.f32 %v1500_v6, %v471_v4  ;;  %v756_v14 = vadd.f32 %v755_v61, %v467_v49  ;;  %v1779_v30 = vadd.f32 %v1500_v6, %v631_v24 }
 0x112   :  { %695 = vst [vmem:[%s1959_s3 + $0xc8] sm:$0xff] %v477_v3  ;;  %v829_v32 = vmul.f32 %v477_v3, %v477_v3  ;;  %727 = vst [vmem:[%s1959_s3 + $0x1c8] sm:$0xff] %v1775_v23 }
 0x113   :  { %694 = vst [vmem:[%s1959_s3 + $0xc0] sm:$0xff] %v472_v12  ;;  %v757_v17 = vadd.f32 %v756_v14, %v472_v12  ;;  %v828_v18 = vmul.f32 %v472_v12, %v472_v12  ;;  %v890_v19 = vadd.f32 %v889_v11, %v827_v9  ;;  %v1132_v21 = vpop.f32.mrb[26].mxu0  ;;  %726 = vst [vmem:[%s1959_s3 + $0x1c0] sm:$0xff] %v1779_v30  ;;  %v1180_v37 = vpop.f32.mrb[26].mxu1 }
 0x114   :  { %v487_v25 = vadd.f32 %v1132_v21, %v1500_v6  ;;  %v481_v29 = vpop.f32.mrb[27].mxu0  ;;  %v1797_v46 = vadd.f32 %v1180_v37, %v1500_v6  ;;  %v641_v48 = vpop.f32.mrb[27].mxu1 }
 0x115   :  { %v891_v34 = vadd.f32 %v890_v19, %v828_v18  ;;  %v482_v35 = vadd.f32 %v1500_v6, %v481_v29  ;;  %v758_v36 = vadd.f32 %v757_v17, %v477_v3  ;;  %v1801_v52 = vadd.f32 %v1500_v6, %v641_v48 }
 0x116   :  { %697 = vst [vmem:[%s1959_s3 + $0xd8] sm:$0xff] %v487_v25  ;;  %v831_v53 = vmul.f32 %v487_v25, %v487_v25  ;;  %729 = vst [vmem:[%s1959_s3 + $0x1d8] sm:$0xff] %v1797_v46 }
 0x117   :  { %696 = vst [vmem:[%s1959_s3 + $0xd0] sm:$0xff] %v482_v35  ;;  %v759_v39 = vadd.f32 %v758_v36, %v482_v35  ;;  %v830_v40 = vmul.f32 %v482_v35, %v482_v35  ;;  %v892_v42 = vadd.f32 %v891_v34, %v829_v32  ;;  %v1135_v44 = vpop.f32.mrb[28].mxu0  ;;  %728 = vst [vmem:[%s1959_s3 + $0x1d0] sm:$0xff] %v1801_v52  ;;  %v1183_v61 = vpop.f32.mrb[28].mxu1 }
 0x118   :  { %v497_v49 = vadd.f32 %v1135_v44, %v1500_v6  ;;  %v491_v50 = vpop.f32.mrb[29].mxu0  ;;  %v1819_v3 = vadd.f32 %v1183_v61, %v1500_v6  ;;  %v651_v4 = vpop.f32.mrb[29].mxu1 }
 0x119   :  { %v893_v56 = vadd.f32 %v892_v42, %v830_v40  ;;  %v492_v57 = vadd.f32 %v1500_v6, %v491_v50  ;;  %v760_v58 = vadd.f32 %v759_v39, %v487_v25  ;;  %v1823_v12 = vadd.f32 %v1500_v6, %v651_v4 }
 0x11a   :  { %699 = vst [vmem:[%s1959_s3 + $0xe8] sm:$0xff] %v497_v49  ;;  %v833_v14 = vmul.f32 %v497_v49, %v497_v49  ;;  %731 = vst [vmem:[%s1959_s3 + $0x1e8] sm:$0xff] %v1819_v3  ;;  %v836_v39 = vmul.f32 %v1515_v20, %v1515_v20  ;;  %v837_v42 = vmul.f32 %v1511_v16, %v1511_v16 }
 0x11b   :  { %698 = vst [vmem:[%s1959_s3 + $0xe0] sm:$0xff] %v492_v57  ;;  %v761_v62 = vadd.f32 %v760_v58, %v492_v57  ;;  %v832_v63 = vmul.f32 %v492_v57, %v492_v57  ;;  %v894_v0 = vadd.f32 %v893_v56, %v831_v53  ;;  %v1138_v2 = vpop.f32.mrb[30].mxu0  ;;  %730 = vst [vmem:[%s1959_s3 + $0x1e0] sm:$0xff] %v1823_v12  ;;  %v1186_v19 = vpop.f32.mrb[30].mxu1 }
 0x11c   :  { %v507_v9 = vadd.f32 %v1138_v2, %v1500_v6  ;;  %v501_v11 = vpop.f32.mrb[31].mxu0  ;;  %v1841_v29 = vadd.f32 %v1186_v19, %v1500_v6  ;;  %v661_v32 = vpop.f32.mrb[31].mxu1  ;;  %v839_v56 = vmul.f32 %v1533_v27, %v1533_v27 }
 0x11d   :  { %v895_v15 = vadd.f32 %v894_v0, %v832_v63  ;;  %v502_v17 = vadd.f32 %v1500_v6, %v501_v11  ;;  %v762_v18 = vadd.f32 %v761_v62, %v497_v49  ;;  %v1844_v34 = vadd.f32 %v1500_v6, %v661_v32 }
 0x11e   :  { %701 = vst [vmem:[%s1959_s3 + $0xf8] sm:$0xff] %v507_v9  ;;  %v835_v35 = vmul.f32 %v507_v9, %v507_v9  ;;  %733 = vst [vmem:[%s1959_s3 + $0x1f8] sm:$0xff] %v1841_v29  ;;  %v838_v49 = vmul.f32 %v1537_v31, %v1537_v31 }
 0x11f   :  { %700 = vst [vmem:[%s1959_s3 + $0xf0] sm:$0xff] %v502_v17  ;;  %v763_v21 = vadd.f32 %v762_v18, %v502_v17  ;;  %v834_v24 = vmul.f32 %v502_v17, %v502_v17  ;;  %v896_v25 = vadd.f32 %v895_v15, %v833_v14  ;;  %732 = vst [vmem:[%s1959_s3 + $0x1f0] sm:$0xff] %v1844_v34 }
 0x121   :  { %v897_v36 = vadd.f32 %v896_v25, %v834_v24  ;;  %v764_v37 = vadd.f32 %v763_v21, %v507_v9 }
 0x123   :  { %v765_v40 = vadd.f32 %v764_v37, %v1515_v20  ;;  %v898_v6 = vadd.f32 %v897_v36, %v835_v35  ;;  %v840_v20 = vmul.f32 %v1559_v45, %v1559_v45 }
 0x125   :  { %v899_v44 = vadd.f32 %v898_v6, %v836_v39  ;;  %v766_v48 = vadd.f32 %v765_v40, %v1511_v16  ;;  %v841_v16 = vmul.f32 %v1555_v41, %v1555_v41 }
 0x127   :  { %v767_v50 = vadd.f32 %v766_v48, %v1537_v31  ;;  %v900_v53 = vadd.f32 %v899_v44, %v837_v42  ;;  %v842_v31 = vmul.f32 %v1581_v59, %v1581_v59 }
 0x129   :  { %v901_v57 = vadd.f32 %v900_v53, %v838_v49  ;;  %v768_v58 = vadd.f32 %v767_v50, %v1533_v27  ;;  %v843_v27 = vmul.f32 %v1577_v55, %v1577_v55 }
 0x12b   :  { %v769_v61 = vadd.f32 %v768_v58, %v1559_v45  ;;  %v902_v62 = vadd.f32 %v901_v57, %v839_v56  ;;  %v844_v45 = vmul.f32 %v1603_v10, %v1603_v10 }
 0x12d   :  { %v903_v63 = vadd.f32 %v902_v62, %v840_v20  ;;  %v770_v0 = vadd.f32 %v769_v61, %v1555_v41  ;;  %v845_v41 = vmul.f32 %v1599_v5, %v1599_v5 }
 0x12f   :  { %v771_v2 = vadd.f32 %v770_v0, %v1581_v59  ;;  %v904_v4 = vadd.f32 %v903_v63, %v841_v16  ;;  %v846_v59 = vmul.f32 %v1625_v26, %v1625_v26 }
 0x131   :  { %v905_v9 = vadd.f32 %v904_v4, %v842_v31  ;;  %v772_v11 = vadd.f32 %v771_v2, %v1577_v55  ;;  %v847_v55 = vmul.f32 %v1621_v22, %v1621_v22 }
 0x133   :  { %v773_v14 = vadd.f32 %v772_v11, %v1603_v10  ;;  %v906_v15 = vadd.f32 %v905_v9, %v843_v27  ;;  %v848_v10 = vmul.f32 %v1647_v43, %v1647_v43 }
 0x135   :  { %v907_v17 = vadd.f32 %v906_v15, %v844_v45  ;;  %v774_v18 = vadd.f32 %v773_v14, %v1599_v5  ;;  %v849_v5 = vmul.f32 %v1643_v38, %v1643_v38 }
 0x137   :  { %v775_v19 = vadd.f32 %v774_v18, %v1625_v26  ;;  %v908_v21 = vadd.f32 %v907_v17, %v845_v41  ;;  %v850_v26 = vmul.f32 %v1669_v60, %v1669_v60 }
 0x139   :  { %v909_v24 = vadd.f32 %v908_v21, %v846_v59  ;;  %v776_v25 = vadd.f32 %v775_v19, %v1621_v22  ;;  %v851_v22 = vmul.f32 %v1665_v54, %v1665_v54 }
 0x13b   :  { %v777_v32 = vadd.f32 %v776_v25, %v1647_v43  ;;  %v910_v35 = vadd.f32 %v909_v24, %v847_v55  ;;  %v852_v43 = vmul.f32 %v1691_v13, %v1691_v13 }
 0x13d   :  { %v911_v36 = vadd.f32 %v910_v35, %v848_v10  ;;  %v778_v37 = vadd.f32 %v777_v32, %v1643_v38  ;;  %v853_v38 = vmul.f32 %v1687_v8, %v1687_v8 }
 0x13f   :  { %v779_v39 = vadd.f32 %v778_v37, %v1669_v60  ;;  %v912_v40 = vadd.f32 %v911_v36, %v849_v5  ;;  %v854_v60 = vmul.f32 %v1713_v33, %v1713_v33 }
 0x141   :  { %v913_v6 = vadd.f32 %v912_v40, %v850_v26  ;;  %v780_v42 = vadd.f32 %v779_v39, %v1665_v54  ;;  %v855_v54 = vmul.f32 %v1709_v28, %v1709_v28 }
 0x143   :  { %v781_v44 = vadd.f32 %v780_v42, %v1691_v13  ;;  %v914_v48 = vadd.f32 %v913_v6, %v851_v22  ;;  %v856_v13 = vmul.f32 %v1735_v51, %v1735_v51 }
 0x145   :  { %v915_v49 = vadd.f32 %v914_v48, %v852_v43  ;;  %v782_v50 = vadd.f32 %v781_v44, %v1687_v8  ;;  %v857_v8 = vmul.f32 %v1731_v47, %v1731_v47 }
 0x147   :  { %v783_v53 = vadd.f32 %v782_v50, %v1713_v33  ;;  %v916_v56 = vadd.f32 %v915_v49, %v853_v38  ;;  %v858_v33 = vmul.f32 %v1757_v7, %v1757_v7 }
 0x149   :  { %v917_v57 = vadd.f32 %v916_v56, %v854_v60  ;;  %v784_v58 = vadd.f32 %v783_v53, %v1709_v28  ;;  %v859_v28 = vmul.f32 %v1753_v1, %v1753_v1 }
 0x14b   :  { %v785_v20 = vadd.f32 %v784_v58, %v1735_v51  ;;  %v918_v61 = vadd.f32 %v917_v57, %v855_v54  ;;  %v860_v51 = vmul.f32 %v1779_v30, %v1779_v30 }
 0x14d   :  { %v919_v62 = vadd.f32 %v918_v61, %v856_v13  ;;  %v786_v16 = vadd.f32 %v785_v20, %v1731_v47  ;;  %v861_v47 = vmul.f32 %v1775_v23, %v1775_v23 }
 0x14f   :  { %v787_v63 = vadd.f32 %v786_v16, %v1757_v7  ;;  %v920_v0 = vadd.f32 %v919_v62, %v857_v8  ;;  %v862_v7 = vmul.f32 %v1801_v52, %v1801_v52 }
 0x151   :  { %v921_v31 = vadd.f32 %v920_v0, %v858_v33  ;;  %v788_v2 = vadd.f32 %v787_v63, %v1753_v1  ;;  %v863_v1 = vmul.f32 %v1797_v46, %v1797_v46 }
 0x153   :  { %v789_v4 = vadd.f32 %v788_v2, %v1779_v30  ;;  %v922_v27 = vadd.f32 %v921_v31, %v859_v28  ;;  %v864_v30 = vmul.f32 %v1823_v12, %v1823_v12 }
 0x155   :  { %v923_v9 = vadd.f32 %v922_v27, %v860_v51  ;;  %v790_v11 = vadd.f32 %v789_v4, %v1775_v23  ;;  %v865_v23 = vmul.f32 %v1819_v3, %v1819_v3 }
 0x157   :  { %v791_v45 = vadd.f32 %v790_v11, %v1801_v52  ;;  %v924_v14 = vadd.f32 %v923_v9, %v861_v47  ;;  %v866_v52 = vmul.f32 %v1844_v34, %v1844_v34 }
 0x159   :  { %v925_v15 = vadd.f32 %v924_v14, %v862_v7  ;;  %v792_v41 = vadd.f32 %v791_v45, %v1797_v46  ;;  %v867_v46 = vmul.f32 %v1841_v29, %v1841_v29 }
 0x15b   :  { %v793_v17 = vadd.f32 %v792_v41, %v1823_v12  ;;  %v926_v18 = vadd.f32 %v925_v15, %v863_v1 }
 0x15d   :  { %v927_v59 = vadd.f32 %v926_v18, %v864_v30  ;;  %v794_v19 = vadd.f32 %v793_v17, %v1819_v3 }
 0x15f   :  { %v795_v21 = vadd.f32 %v794_v19, %v1844_v34  ;;  %v928_v55 = vadd.f32 %v927_v59, %v865_v23 }
 0x161   :  { %v796_v24 = vadd.f32 %v795_v21, %v1841_v29  ;;  %v929_v25 = vadd.f32 %v928_v55, %v866_v52 }
 0x163   :  { %v797_v12 = vrot.slane %v796_v24, 4  ;;  %v930_v10 = vadd.f32 %v929_v25, %v867_v46 }
 0x165   :  { %v798_v32 = vadd.f32 %v797_v12, %v796_v24  ;;  %v931_v35 = vrot.slane %v930_v10, 4 }
 0x167   :  { %v799_v5 = vrot.slane %v798_v32, 2  ;;  %v932_v36 = vadd.f32 %v931_v35, %v930_v10 }
 0x169   :  { %v800_v37 = vadd.f32 %v799_v5, %v798_v32  ;;  %v933_v3 = vrot.slane %v932_v36, 2 }
 0x16b   :  { %v801_v26 = vrot.slane %v800_v37, 1  ;;  %v934_v39 = vadd.f32 %v933_v3, %v932_v36 }
 0x16d   :  { %v802_v40 = vadd.f32 %v801_v26, %v800_v37  ;;  %v935_v22 = vrot.slane %v934_v39, 1 }
 0x16f   :  { %803 = vst [vmem:[%s1960_s4] sm:$0xff] %v802_v40  ;;  %v936_v34 = vadd.f32 %v935_v22, %v934_v39 }
 0x171   :  { %937 = vst [vmem:[%s1961_s5] sm:$0xff] %v936_v34 }

// kernel: cnn_forward.11
= control target key start
LH: loop header
LB: loop body
LE: loop exit
PB: predicated region body
PF: predicated region fallthrough
CT: control target
= control target key end

     0   :  { %v32_v0 = vlaneseq  ;;  %s240_s1 = inlined_call_operand.vmem [shape: f32[1,256], index: 1, kind: input, shape index: {}]   ;;  %s241_s2 = inlined_call_operand.vmem [shape: f32[1,256], index: 2, kind: input, shape index: {}]   ;;  %s242_s0 = inlined_call_operand.vmem [shape: f32[64,256], index: 0, kind: input, shape index: {}]   ;;  %s243_s3 = inlined_call_operand.vmem [shape: f32[64,128], index: 3, kind: output, shape index: {}]  }
   0x1   :  { %v30_v2 = vld [vmem:[%s240_s1] sm:$0x3]  ;;  %v15_v5 = vld [vmem:[%s242_s0 + $0x8] sm:$0xff]  ;;  %v16_v8 = vld [vmem:[%s242_s0 + $0x10] sm:$0xff] }
   0x2   :  { %v33_v1 = vshrl.u32 %v32_v0, 7  ;;  %v58_v3 = vld [vmem:[%s241_s2] sm:$0x3]  ;;  %v17_v9 = vld [vmem:[%s242_s0 + $0x18] sm:$0xff]  ;;  %v19_v15 = vld [vmem:[%s242_s0 + $0x28] sm:$0xff] }
   0x3   :  { %v14_v4 = vld [vmem:[%s242_s0] sm:$0xff]  ;;  %v20_v16 = vld [vmem:[%s242_s0 + $0x30] sm:$0xff]  ;;  %v21_v17 = vld [vmem:[%s242_s0 + $0x38] sm:$0xff] }
   0x4   :  { %v34_v6 = vsub.s32 0, %v33_v1  ;;  %v38_v7 = vsub.s32 1, %v33_v1  ;;  %v18_v10 = vld [vmem:[%s242_s0 + $0x20] sm:$0xff]  ;;  %v23_v35 = vld [vmem:[%s242_s0 + $0x48] sm:$0xff]  ;;  %v24_v40 = vld [vmem:[%s242_s0 + $0x50] sm:$0xff] }
   0x5   :  { %v22_v34 = vld [vmem:[%s242_s0 + $0x40] sm:$0xff]  ;;  %v25_v41 = vld [vmem:[%s242_s0 + $0x58] sm:$0xff]  ;;  %v27_v47 = vld [vmem:[%s242_s0 + $0x68] sm:$0xff] }
   0x6   :  { %v35_v11 = vrot.slane %v30_v2, %v34_v6  ;;  %v39_v12 = vrot.slane %v30_v2, %v38_v7  ;;  %v163_v13 = vrot.slane %v58_v3, %v34_v6  ;;  %v165_v14 = vrot.slane %v58_v3, %v38_v7  ;;  %v26_v46 = vld [vmem:[%s242_s0 + $0x60] sm:$0xff]  ;;  %v28_v52 = vld [vmem:[%s242_s0 + $0x70] sm:$0xff]  ;;  %v29_v53 = vld [vmem:[%s242_s0 + $0x78] sm:$0xff] }
   0x8   :  { %v42_v18 = vmul.f32 %v35_v11, %v14_v4  ;;  %v43_v19 = vmul.f32 %v39_v12, %v15_v5  ;;  %v44_v20 = vmul.f32 %v35_v11, %v16_v8  ;;  %v45_v21 = vmul.f32 %v39_v12, %v17_v9 }
   0x9   :  { %v46_v22 = vmul.f32 %v35_v11, %v18_v10  ;;  %v47_v23 = vmul.f32 %v39_v12, %v19_v15  ;;  %v48_v24 = vmul.f32 %v35_v11, %v20_v16  ;;  %v49_v25 = vmul.f32 %v39_v12, %v21_v17 }
   0xa   :  { %v70_v26 = vadd.f32 %v163_v13, %v42_v18  ;;  %v71_v27 = vadd.f32 %v165_v14, %v43_v19  ;;  %v72_v28 = vadd.f32 %v163_v13, %v44_v20  ;;  %v73_v29 = vadd.f32 %v165_v14, %v45_v21 }
   0xb   :  { %v74_v30 = vadd.f32 %v163_v13, %v46_v22  ;;  %v75_v31 = vadd.f32 %v165_v14, %v47_v23  ;;  %v76_v32 = vadd.f32 %v163_v13, %v48_v24  ;;  %v77_v33 = vadd.f32 %v165_v14, %v49_v25 }
   0xc   :  { %v86_v36 = vmax.f32 %v70_v26, 0.0  ;;  %v87_v37 = vmax.f32 %v71_v27, 0.0  ;;  %v88_v38 = vmax.f32 %v72_v28, 0.0  ;;  %v89_v39 = vmax.f32 %v73_v29, 0.0 }
   0xd   :  { %v90_v42 = vmax.f32 %v74_v30, 0.0  ;;  %v91_v43 = vmax.f32 %v75_v31, 0.0  ;;  %v92_v44 = vmax.f32 %v76_v32, 0.0  ;;  %v93_v45 = vmax.f32 %v77_v33, 0.0 }
   0xe   :  { %v102_v48 = vmax.f32 %v86_v36, %v87_v37  ;;  %v103_v49 = vmax.f32 %v88_v38, %v89_v39  ;;  %v50_v50 = vmul.f32 %v35_v11, %v22_v34  ;;  %v51_v51 = vmul.f32 %v39_v12, %v23_v35 }
   0xf   :  { %v104_v54 = vmax.f32 %v90_v42, %v91_v43  ;;  %v105_v55 = vmax.f32 %v92_v44, %v93_v45  ;;  %v52_v56 = vmul.f32 %v35_v11, %v24_v40  ;;  %v53_v57 = vmul.f32 %v39_v12, %v25_v41 }
  0x10   :  { %110 = vst [vmem:[%s243_s3] sm:$0xff] %v102_v48  ;;  %111 = vst [vmem:[%s243_s3 + $0x8] sm:$0xff] %v103_v49  ;;  %v78_v58 = vadd.f32 %v163_v13, %v50_v50  ;;  %v79_v59 = vadd.f32 %v165_v14, %v51_v51  ;;  %v54_v60 = vmul.f32 %v35_v11, %v26_v46 }
  0x11   :  { %v55_v61 = vmul.f32 %v39_v12, %v27_v47  ;;  %112 = vst [vmem:[%s243_s3 + $0x10] sm:$0xff] %v104_v54  ;;  %113 = vst [vmem:[%s243_s3 + $0x18] sm:$0xff] %v105_v55  ;;  %v80_v62 = vadd.f32 %v163_v13, %v52_v56  ;;  %v81_v63 = vadd.f32 %v165_v14, %v53_v57 }
  0x12   :  { %v56_v0 = vmul.f32 %v35_v11, %v28_v52  ;;  %v57_v1 = vmul.f32 %v39_v12, %v29_v53  ;;  %v94_v2 = vmax.f32 %v78_v58, 0.0  ;;  %v95_v3 = vmax.f32 %v79_v59, 0.0 }
  0x13   :  { %v82_v4 = vadd.f32 %v163_v13, %v54_v60  ;;  %v83_v5 = vadd.f32 %v165_v14, %v55_v61  ;;  %v96_v6 = vmax.f32 %v80_v62, 0.0  ;;  %v97_v7 = vmax.f32 %v81_v63, 0.0 }
  0x14   :  { %v84_v8 = vadd.f32 %v163_v13, %v56_v0  ;;  %v85_v9 = vadd.f32 %v165_v14, %v57_v1  ;;  %v106_v10 = vmax.f32 %v94_v2, %v95_v3 }
  0x15   :  { %v98_v15 = vmax.f32 %v82_v4, 0.0  ;;  %v99_v16 = vmax.f32 %v83_v5, 0.0  ;;  %v107_v17 = vmax.f32 %v96_v6, %v97_v7 }
  0x16   :  { %v100_v18 = vmax.f32 %v84_v8, 0.0  ;;  %v101_v19 = vmax.f32 %v85_v9, 0.0  ;;  %114 = vst [vmem:[%s243_s3 + $0x20] sm:$0xff] %v106_v10 }
  0x17   :  { %v108_v11 = vmax.f32 %v98_v15, %v99_v16  ;;  %115 = vst [vmem:[%s243_s3 + $0x28] sm:$0xff] %v107_v17 }
  0x18   :  { %v109_v12 = vmax.f32 %v100_v18, %v101_v19 }
  0x19   :  { %116 = vst [vmem:[%s243_s3 + $0x30] sm:$0xff] %v108_v11 }
  0x1a   :  { %117 = vst [vmem:[%s243_s3 + $0x38] sm:$0xff] %v109_v12 }

// kernel: cnn_forward.10
= control target key start
LH: loop header
LB: loop body
LE: loop exit
PB: predicated region body
PF: predicated region fallthrough
CT: control target
= control target key end

     0   :  { %v722_v2 = vmov 0.0|0.0   ;;  %vm138_vm0 = vcmask 130048   ;;  %s1195_s1 = inlined_call_operand.vmem [shape: f32[400,128], index: 1, kind: input, shape index: {}]   ;;  %s1196_s0 = inlined_call_operand.vmem [shape: f32[128,400], index: 0, kind: input, shape index: {}]   ;;  %s1197_s2 = inlined_call_operand.vmem [shape: f32[1,128], index: 2, kind: input, shape index: {}]   ;;  %s1198_s3 = inlined_call_operand.vmem [shape: f32[128,128], index: 3, kind: output, shape index: {0}]   ;;  %s1199_s4 = inlined_call_operand.vmem [shape: f32[8,128], index: 4, kind: output, shape index: {1}]   ;;  %s1200_s5 = inlined_call_operand.vmem [shape: f32[8,128], index: 5, kind: output, shape index: {2}]  }
   0x1   :  { %v97_v0 = vld [vmem:[%s1195_s1 + $0x80] sm:$0xff]  ;;  %v98_v1 = vld [vmem:[%s1195_s1 + $0x88] sm:$0xff]  ;;  %694 = vmatprep.subr.bf16.mxu1 %v722_v2  ;;  %v99_v10 = vld [vmem:[%s1195_s1 + $0x90] sm:$0xff] }
   0x2   :  { %v81_v3 = vld [vmem:[%s1195_s1] sm:$0xff]  ;;  %v662_v4 = vpack.c.bf16 %v98_v1, %v97_v0  ;;  %v82_v5 = vld [vmem:[%s1195_s1 + $0x8] sm:$0xff]  ;;  %v100_v11 = vld [vmem:[%s1195_s1 + $0x98] sm:$0xff] }
   0x3   :  { %v113_v6 = vld [vmem:[%s1195_s1 + $0x100] sm:$0xff]  ;;  %v114_v7 = vld [vmem:[%s1195_s1 + $0x108] sm:$0xff]  ;;  %v664_v8 = vpack.c.bf16 %v82_v5, %v81_v3  ;;  %v83_v12 = vld [vmem:[%s1195_s1 + $0x10] sm:$0xff]  ;;  %v666_v13 = vpack.c.bf16 %v100_v11, %v99_v10 }
   0x4   :  { %v695_v9 = vpack.c.bf16 %v114_v7, %v113_v6  ;;  %663 = vmatprep.subr.bf16.mxu0 %v662_v4  ;;  %v84_v14 = vld [vmem:[%s1195_s1 + $0x18] sm:$0xff]  ;;  %v115_v15 = vld [vmem:[%s1195_s1 + $0x110] sm:$0xff]  ;;  %v101_v19 = vld [vmem:[%s1195_s1 + $0xa0] sm:$0xff] }
   0x5   :  { %v116_v16 = vld [vmem:[%s1195_s1 + $0x118] sm:$0xff]  ;;  %665 = vmatpush3.bf16.msra.mxu0 %v664_v8  ;;  %v668_v17 = vpack.c.bf16 %v84_v14, %v83_v12  ;;  %v102_v20 = vld [vmem:[%s1195_s1 + $0xa8] sm:$0xff]  ;;  %v85_v21 = vld [vmem:[%s1195_s1 + $0x20] sm:$0xff] }
   0x6   :  { %696 = vmatpush1.bf16.msra.mxu1 %v695_v9  ;;  %v698_v18 = vpack.c.bf16 %v116_v16, %v115_v15  ;;  %667 = vmatprep.subr.bf16.mxu0 %v666_v13  ;;  %v670_v22 = vpack.c.bf16 %v102_v20, %v101_v19  ;;  %v86_v23 = vld [vmem:[%s1195_s1 + $0x28] sm:$0xff]  ;;  %v117_v24 = vld [vmem:[%s1195_s1 + $0x120] sm:$0xff]  ;;  %v103_v26 = vld [vmem:[%s1195_s1 + $0xb0] sm:$0xff] }
   0x7   :  { %697 = vmatprep.subr.bf16.mxu1 %v722_v2  ;;  %v118_v25 = vld [vmem:[%s1195_s1 + $0x128] sm:$0xff]  ;;  %v104_v27 = vld [vmem:[%s1195_s1 + $0xb8] sm:$0xff]  ;;  %v672_v28 = vpack.c.bf16 %v86_v23, %v85_v21  ;;  %v87_v30 = vld [vmem:[%s1195_s1 + $0x30] sm:$0xff] }
   0x8   :  { %v701_v29 = vpack.c.bf16 %v118_v25, %v117_v24  ;;  %v674_v31 = vpack.c.bf16 %v104_v27, %v103_v26  ;;  %v88_v32 = vld [vmem:[%s1195_s1 + $0x38] sm:$0xff]  ;;  %v119_v33 = vld [vmem:[%s1195_s1 + $0x130] sm:$0xff]  ;;  %v105_v35 = vld [vmem:[%s1195_s1 + $0xc0] sm:$0xff] }
   0x9   :  { %669 = vmatpush3.bf16.msra.mxu0 %v668_v17  ;;  %v120_v34 = vld [vmem:[%s1195_s1 + $0x138] sm:$0xff]  ;;  %v106_v36 = vld [vmem:[%s1195_s1 + $0xc8] sm:$0xff]  ;;  %v676_v37 = vpack.c.bf16 %v88_v32, %v87_v30  ;;  %v89_v39 = vld [vmem:[%s1195_s1 + $0x40] sm:$0xff] }
   0xa   :  { %699 = vmatpush1.bf16.msra.mxu1 %v698_v18  ;;  %671 = vmatprep.subr.bf16.mxu0 %v670_v22  ;;  %v704_v38 = vpack.c.bf16 %v120_v34, %v119_v33  ;;  %v678_v40 = vpack.c.bf16 %v106_v36, %v105_v35  ;;  %v90_v41 = vld [vmem:[%s1195_s1 + $0x48] sm:$0xff]  ;;  %v121_v42 = vld [vmem:[%s1195_s1 + $0x140] sm:$0xff]  ;;  %v107_v44 = vld [vmem:[%s1195_s1 + $0xd0] sm:$0xff] }
   0xb   :  { %700 = vmatprep.subr.bf16.mxu1 %v722_v2  ;;  %v122_v43 = vld [vmem:[%s1195_s1 + $0x148] sm:$0xff]  ;;  %v108_v45 = vld [vmem:[%s1195_s1 + $0xd8] sm:$0xff]  ;;  %v680_v46 = vpack.c.bf16 %v90_v41, %v89_v39  ;;  %v91_v48 = vld [vmem:[%s1195_s1 + $0x50] sm:$0xff] }
   0xc   :  { %v707_v47 = vpack.c.bf16 %v122_v43, %v121_v42  ;;  %v92_v49 = vld [vmem:[%s1195_s1 + $0x58] sm:$0xff]  ;;  %v18_v50 = vld [vmem:[%s1196_s0 + $0x8] sm:$0xff]  ;;  %v682_v51 = vpack.c.bf16 %v108_v45, %v107_v44  ;;  %v123_v52 = vld [vmem:[%s1195_s1 + $0x150] sm:$0xff] }
   0xd   :  { %673 = vmatpush3.bf16.msra.mxu0 %v672_v28  ;;  %v124_v53 = vld [vmem:[%s1195_s1 + $0x158] sm:$0xff]  ;;  %v109_v55 = vld [vmem:[%s1195_s1 + $0xe0] sm:$0xff]  ;;  %v110_v56 = vld [vmem:[%s1195_s1 + $0xe8] sm:$0xff]  ;;  %251 = vmatprep.mubr.f32.mxu0 %v18_v50  ;;  %v684_v57 = vpack.c.bf16 %v92_v49, %v91_v48 }
   0xe   :  { %702 = vmatpush1.bf16.msra.mxu1 %v701_v29  ;;  %675 = vmatprep.subr.bf16.mxu0 %v674_v31  ;;  %v20_v54 = vld [vmem:[%s1196_s0 + $0x18] sm:$0xff]  ;;  %v710_v58 = vpack.c.bf16 %v124_v53, %v123_v52  ;;  %v93_v59 = vld [vmem:[%s1195_s1 + $0x60] sm:$0xff]  ;;  %v686_v60 = vpack.c.bf16 %v110_v56, %v109_v55  ;;  %v94_v61 = vld [vmem:[%s1195_s1 + $0x68] sm:$0xff] }
   0xf   :  { %703 = vmatprep.subr.bf16.mxu1 %v722_v2  ;;  %566 = vmatprep.mubr.msk.f32.mxu1 %vm138_vm0, %v20_v54  ;;  %v125_v62 = vld [vmem:[%s1195_s1 + $0x160] sm:$0xff]  ;;  %v126_v63 = vld [vmem:[%s1195_s1 + $0x168] sm:$0xff]  ;;  %v111_v0 = vld [vmem:[%s1195_s1 + $0xf0] sm:$0xff]  ;;  %v688_v3 = vpack.c.bf16 %v94_v61, %v93_v59 }
  0x10   :  { %v112_v1 = vld [vmem:[%s1195_s1 + $0xf8] sm:$0xff]  ;;  %v713_v4 = vpack.c.bf16 %v126_v63, %v125_v62  ;;  %v95_v5 = vld [vmem:[%s1195_s1 + $0x70] sm:$0xff]  ;;  %v129_v12 = vld [vmem:[%s1195_s1 + $0x180] sm:$0xff] }
  0x11   :  { %677 = vmatpush3.bf16.msra.mxu0 %v676_v37  ;;  %v690_v6 = vpack.c.bf16 %v112_v1, %v111_v0  ;;  %v96_v7 = vld [vmem:[%s1195_s1 + $0x78] sm:$0xff]  ;;  %v127_v8 = vld [vmem:[%s1195_s1 + $0x170] sm:$0xff]  ;;  %v130_v13 = vld [vmem:[%s1195_s1 + $0x188] sm:$0xff] }
  0x12   :  { %705 = vmatpush1.bf16.msra.mxu1 %v704_v38  ;;  %679 = vmatprep.subr.bf16.mxu0 %v678_v40  ;;  %v128_v9 = vld [vmem:[%s1195_s1 + $0x178] sm:$0xff]  ;;  %v692_v10 = vpack.c.bf16 %v96_v7, %v95_v5  ;;  %v17_v14 = vld [vmem:[%s1196_s0] sm:$0xff]  ;;  %v719_v15 = vpack.c.bf16 %v130_v13, %v129_v12  ;;  %v22_v16 = vld [vmem:[%s1196_s0 + $0x28] sm:$0xff] }
  0x13   :  { %706 = vmatprep.subr.bf16.mxu1 %v722_v2  ;;  %v716_v11 = vpack.c.bf16 %v128_v9, %v127_v8  ;;  %v21_v17 = vld [vmem:[%s1196_s0 + $0x20] sm:$0xff]  ;;  %v19_v18 = vld [vmem:[%s1196_s0 + $0x10] sm:$0xff]  ;;  %v26_v19 = vld [vmem:[%s1196_s0 + $0x48] sm:$0xff] }
  0x14   :  { %v25_v20 = vld [vmem:[%s1196_s0 + $0x40] sm:$0xff]  ;;  %v23_v21 = vld [vmem:[%s1196_s0 + $0x30] sm:$0xff]  ;;  %v30_v22 = vld [vmem:[%s1196_s0 + $0x68] sm:$0xff] }
  0x15   :  { %681 = vmatpush3.bf16.msra.mxu0 %v680_v46  ;;  %v28_v23 = vld [vmem:[%s1196_s0 + $0x58] sm:$0xff]  ;;  %v29_v24 = vld [vmem:[%s1196_s0 + $0x60] sm:$0xff]  ;;  %v27_v25 = vld [vmem:[%s1196_s0 + $0x50] sm:$0xff] }
  0x16   :  { %708 = vmatpush1.bf16.msra.mxu1 %v707_v47  ;;  %683 = vmatprep.subr.bf16.mxu0 %v682_v51  ;;  %v34_v26 = vld [vmem:[%s1196_s0 + $0x88] sm:$0xff]  ;;  %v32_v27 = vld [vmem:[%s1196_s0 + $0x78] sm:$0xff]  ;;  %v33_v28 = vld [vmem:[%s1196_s0 + $0x80] sm:$0xff] }
  0x17   :  { %709 = vmatprep.subr.bf16.mxu1 %v722_v2  ;;  %v31_v29 = vld [vmem:[%s1196_s0 + $0x70] sm:$0xff]  ;;  %v38_v30 = vld [vmem:[%s1196_s0 + $0xa8] sm:$0xff]  ;;  %v36_v31 = vld [vmem:[%s1196_s0 + $0x98] sm:$0xff] }
  0x18   :  { %v37_v32 = vld [vmem:[%s1196_s0 + $0xa0] sm:$0xff]  ;;  %v35_v33 = vld [vmem:[%s1196_s0 + $0x90] sm:$0xff]  ;;  %v42_v34 = vld [vmem:[%s1196_s0 + $0xc8] sm:$0xff] }
  0x19   :  { %685 = vmatpush3.bf16.msra.mxu0 %v684_v57  ;;  %v40_v35 = vld [vmem:[%s1196_s0 + $0xb8] sm:$0xff]  ;;  %v41_v36 = vld [vmem:[%s1196_s0 + $0xc0] sm:$0xff]  ;;  %v39_v37 = vld [vmem:[%s1196_s0 + $0xb0] sm:$0xff] }
  0x1a   :  { %711 = vmatpush1.bf16.msra.mxu1 %v710_v58  ;;  %687 = vmatprep.subr.bf16.mxu0 %v686_v60  ;;  %v46_v38 = vld [vmem:[%s1196_s0 + $0xe8] sm:$0xff]  ;;  %v44_v39 = vld [vmem:[%s1196_s0 + $0xd8] sm:$0xff]  ;;  %v45_v40 = vld [vmem:[%s1196_s0 + $0xe0] sm:$0xff] }
  0x1b   :  { %712 = vmatprep.subr.bf16.mxu1 %v722_v2  ;;  %v43_v41 = vld [vmem:[%s1196_s0 + $0xd0] sm:$0xff]  ;;  %v50_v42 = vld [vmem:[%s1196_s0 + $0x108] sm:$0xff]  ;;  %v48_v43 = vld [vmem:[%s1196_s0 + $0xf8] sm:$0xff] }
  0x1c   :  { %v49_v44 = vld [vmem:[%s1196_s0 + $0x100] sm:$0xff]  ;;  %v47_v45 = vld [vmem:[%s1196_s0 + $0xf0] sm:$0xff]  ;;  %v54_v46 = vld [vmem:[%s1196_s0 + $0x128] sm:$0xff] }
  0x1d   :  { %689 = vmatpush3.bf16.msra.mxu0 %v688_v3  ;;  %v52_v47 = vld [vmem:[%s1196_s0 + $0x118] sm:$0xff]  ;;  %v53_v48 = vld [vmem:[%s1196_s0 + $0x120] sm:$0xff]  ;;  %v51_v49 = vld [vmem:[%s1196_s0 + $0x110] sm:$0xff] }
  0x1e   :  { %714 = vmatpush1.bf16.msra.mxu1 %v713_v4  ;;  %691 = vmatprep.subr.bf16.mxu0 %v690_v6  ;;  %v58_v50 = vld [vmem:[%s1196_s0 + $0x148] sm:$0xff]  ;;  %v56_v51 = vld [vmem:[%s1196_s0 + $0x138] sm:$0xff]  ;;  %v57_v52 = vld [vmem:[%s1196_s0 + $0x140] sm:$0xff] }
  0x1f   :  { %715 = vmatprep.subr.bf16.mxu1 %v722_v2  ;;  %v55_v53 = vld [vmem:[%s1196_s0 + $0x130] sm:$0xff]  ;;  %v62_v54 = vld [vmem:[%s1196_s0 + $0x168] sm:$0xff]  ;;  %v60_v55 = vld [vmem:[%s1196_s0 + $0x158] sm:$0xff] }
  0x20   :  { %v61_v56 = vld [vmem:[%s1196_s0 + $0x160] sm:$0xff]  ;;  %v59_v57 = vld [vmem:[%s1196_s0 + $0x150] sm:$0xff]  ;;  %v66_v58 = vld [vmem:[%s1196_s0 + $0x188] sm:$0xff] }
  0x21   :  { %693 = vmatpush3.bf16.msra.mxu0 %v692_v10  ;;  %v64_v59 = vld [vmem:[%s1196_s0 + $0x178] sm:$0xff]  ;;  %v65_v60 = vld [vmem:[%s1196_s0 + $0x180] sm:$0xff]  ;;  %v63_v61 = vld [vmem:[%s1196_s0 + $0x170] sm:$0xff] }
  0x22   :  { %717 = vmatpush1.bf16.msra.mxu1 %v716_v11  ;;  %v70_v62 = vld [vmem:[%s1196_s0 + $0x1a8] sm:$0xff]  ;;  %v68_v63 = vld [vmem:[%s1196_s0 + $0x198] sm:$0xff]  ;;  %v69_v0 = vld [vmem:[%s1196_s0 + $0x1a0] sm:$0xff] }
  0x23   :  { %718 = vmatprep.subr.bf16.mxu1 %v722_v2  ;;  %v24_v2 = vld [vmem:[%s1196_s0 + $0x38] sm:$0xff]  ;;  %v67_v1 = vld [vmem:[%s1196_s0 + $0x190] sm:$0xff]  ;;  %v74_v3 = vld [vmem:[%s1196_s0 + $0x1c8] sm:$0xff] }
  0x24   :  { %252 = vmatmul.mubr.f32.vlgmr.msra.gmra.mrb[0].mxu0 %v17_v14  ;;  %v72_v4 = vld [vmem:[%s1196_s0 + $0x1b8] sm:$0xff]  ;;  %v73_v5 = vld [vmem:[%s1196_s0 + $0x1c0] sm:$0xff]  ;;  %v71_v6 = vld [vmem:[%s1196_s0 + $0x1b0] sm:$0xff] }
  0x25   :  { %256 = vmatprep.mubr.f32.mxu0 %v22_v16  ;;  %v78_v7 = vld [vmem:[%s1196_s0 + $0x1e8] sm:$0xff]  ;;  %v76_v8 = vld [vmem:[%s1196_s0 + $0x1d8] sm:$0xff]  ;;  %v77_v9 = vld [vmem:[%s1196_s0 + $0x1e0] sm:$0xff] }
  0x26   :  { %720 = vmatpush1.bf16.msra.mxu1 %v719_v15  ;;  %v75_v10 = vld [vmem:[%s1196_s0 + $0x1d0] sm:$0xff]  ;;  %v80_v11 = vld [vmem:[%s1196_s0 + $0x1f8] sm:$0xff]  ;;  %v1123_v15 = vld [vmem:[%s1197_s2] ss:$0 sm:$0xff] }
  0x27   :  { %v79_v12 = vld [vmem:[%s1196_s0 + $0x1f0] sm:$0xff] }
  0x28   :  { %257 = vmatmul.mubr.f32.gmra.mrb[2].mxu0 %v21_v17 }
  0x29   :  { %397 = vmatmul.mubr.f32.vlgmr.msra.gmra.mrb[0].mxu1 %v19_v18  ;;  %261 = vmatprep.mubr.f32.mxu0 %v26_v19 }
  0x2a   :  { %567 = vmatprep.mubr.msk.f32.mxu1 %vm138_vm0, %v24_v2 }
  0x2c   :  { %262 = vmatmul.mubr.f32.gmra.mrb[4].mxu0 %v25_v20 }
  0x2d   :  { %402 = vmatmul.mubr.f32.gmra.mrb[2].mxu1 %v23_v21  ;;  %266 = vmatprep.mubr.f32.mxu0 %v30_v22 }
  0x2e   :  { %568 = vmatprep.mubr.msk.f32.mxu1 %vm138_vm0, %v28_v23 }
  0x30   :  { %267 = vmatmul.mubr.f32.gmra.mrb[6].mxu0 %v29_v24 }
  0x31   :  { %407 = vmatmul.mubr.f32.gmra.mrb[4].mxu1 %v27_v25  ;;  %271 = vmatprep.mubr.f32.mxu0 %v34_v26 }
  0x32   :  { %569 = vmatprep.mubr.msk.f32.mxu1 %vm138_vm0, %v32_v27 }
  0x34   :  { %272 = vmatmul.mubr.f32.gmra.mrb[8].mxu0 %v33_v28 }
  0x35   :  { %412 = vmatmul.mubr.f32.gmra.mrb[6].mxu1 %v31_v29  ;;  %276 = vmatprep.mubr.f32.mxu0 %v38_v30 }
  0x36   :  { %570 = vmatprep.mubr.msk.f32.mxu1 %vm138_vm0, %v36_v31 }
  0x38   :  { %277 = vmatmul.mubr.f32.gmra.mrb[10].mxu0 %v37_v32 }
  0x39   :  { %417 = vmatmul.mubr.f32.gmra.mrb[8].mxu1 %v35_v33  ;;  %281 = vmatprep.mubr.f32.mxu0 %v42_v34 }
  0x3a   :  { %571 = vmatprep.mubr.msk.f32.mxu1 %vm138_vm0, %v40_v35 }
  0x3c   :  { %282 = vmatmul.mubr.f32.gmra.mrb[12].mxu0 %v41_v36 }
  0x3d   :  { %422 = vmatmul.mubr.f32.gmra.mrb[10].mxu1 %v39_v37  ;;  %286 = vmatprep.mubr.f32.mxu0 %v46_v38 }
  0x3e   :  { %572 = vmatprep.mubr.msk.f32.mxu1 %vm138_vm0, %v44_v39 }
  0x40   :  { %287 = vmatmul.mubr.f32.gmra.mrb[14].mxu0 %v45_v40 }
  0x41   :  { %427 = vmatmul.mubr.f32.gmra.mrb[12].mxu1 %v43_v41  ;;  %291 = vmatprep.mubr.f32.mxu0 %v50_v42 }
  0x42   :  { %573 = vmatprep.mubr.msk.f32.mxu1 %vm138_vm0, %v48_v43 }
  0x44   :  { %292 = vmatmul.mubr.f32.gmra.mrb[16].mxu0 %v49_v44 }
  0x45   :  { %432 = vmatmul.mubr.f32.gmra.mrb[14].mxu1 %v47_v45  ;;  %296 = vmatprep.mubr.f32.mxu0 %v54_v46 }
  0x46   :  { %574 = vmatprep.mubr.msk.f32.mxu1 %vm138_vm0, %v52_v47 }
  0x48   :  { %297 = vmatmul.mubr.f32.gmra.mrb[18].mxu0 %v53_v48 }
  0x49   :  { %437 = vmatmul.mubr.f32.gmra.mrb[16].mxu1 %v51_v49  ;;  %301 = vmatprep.mubr.f32.mxu0 %v58_v50 }
  0x4a   :  { %575 = vmatprep.mubr.msk.f32.mxu1 %vm138_vm0, %v56_v51 }
  0x4c   :  { %302 = vmatmul.mubr.f32.gmra.mrb[20].mxu0 %v57_v52 }
  0x4d   :  { %442 = vmatmul.mubr.f32.gmra.mrb[18].mxu1 %v55_v53  ;;  %306 = vmatprep.mubr.f32.mxu0 %v62_v54 }
  0x4e   :  { %576 = vmatprep.mubr.msk.f32.mxu1 %vm138_vm0, %v60_v55 }
  0x50   :  { %307 = vmatmul.mubr.f32.gmra.mrb[22].mxu0 %v61_v56 }
  0x51   :  { %447 = vmatmul.mubr.f32.gmra.mrb[20].mxu1 %v59_v57  ;;  %311 = vmatprep.mubr.f32.mxu0 %v66_v58 }
  0x52   :  { %577 = vmatprep.mubr.msk.f32.mxu1 %vm138_vm0, %v64_v59 }
  0x54   :  { %312 = vmatmul.mubr.f32.gmra.mrb[24].mxu0 %v65_v60 }
  0x55   :  { %452 = vmatmul.mubr.f32.gmra.mrb[22].mxu1 %v63_v61  ;;  %316 = vmatprep.mubr.f32.mxu0 %v70_v62 }
  0x56   :  { %578 = vmatprep.mubr.msk.f32.mxu1 %vm138_vm0, %v68_v63 }
  0x58   :  { %317 = vmatmul.mubr.f32.gmra.mrb[26].mxu0 %v69_v0 }
  0x59   :  { %457 = vmatmul.mubr.f32.gmra.mrb[24].mxu1 %v67_v1  ;;  %321 = vmatprep.mubr.f32.mxu0 %v74_v3 }
  0x5a   :  { %579 = vmatprep.mubr.msk.f32.mxu1 %vm138_vm0, %v72_v4 }
  0x5c   :  { %322 = vmatmul.mubr.f32.gmra.mrb[28].mxu0 %v73_v5 }
  0x5d   :  { %462 = vmatmul.mubr.f32.gmra.mrb[26].mxu1 %v71_v6  ;;  %326 = vmatprep.mubr.f32.mxu0 %v78_v7 }
  0x5e   :  { %580 = vmatprep.mubr.msk.f32.mxu1 %vm138_vm0, %v76_v8 }
  0x60   :  { %327 = vmatmul.mubr.f32.gmra.mrb[30].mxu0 %v77_v9 }
  0x61   :  { %467 = vmatmul.mubr.f32.gmra.mrb[28].mxu1 %v75_v10 }
  0x62   :  { %581 = vmatprep.mubr.msk.f32.mxu1 %vm138_vm0, %v80_v11 }
  0x65   :  { %472 = vmatmul.mubr.f32.gmra.mrb[30].mxu1 %v79_v12 }
  0xf7   :  { %v614_v13 = vpop.f32.mrb[0].mxu0 }
  0xf8   :  { %v615_v14 = vpop.f32.mrb[1].mxu0 }
  0xf9   :  { %v616_v16 = vadd.f32 %v615_v14, %v614_v13 }
  0xfb   :  { %v617_v17 = vpop.f32.mrb[2].mxu0  ;;  %v254_v18 = vadd.f32 %v616_v16, %v1123_v15 }
  0xfc   :  { %v398_v19 = vpop.f32.mrb[0].mxu1  ;;  %v618_v2 = vpop.f32.mrb[3].mxu0 }
  0xfd   :  { %v400_v20 = vpop.f32.mrb[1].mxu1  ;;  %v399_v21 = vadd.f32 %v398_v19, %v254_v18  ;;  %v619_v22 = vadd.f32 %v618_v2, %v617_v17 }
  0xff   :  { %477 = vst [vmem:[%s1198_s3] sm:$0xff] %v399_v21  ;;  %v620_v23 = vpop.f32.mrb[4].mxu0  ;;  %v259_v24 = vadd.f32 %v619_v22, %v1123_v15  ;;  %v515_v30 = vmul.f32 %v399_v21, %v399_v21 }
 0x100   :  { %v403_v25 = vpop.f32.mrb[2].mxu1  ;;  %v621_v26 = vpop.f32.mrb[5].mxu0 }
 0x101   :  { %v405_v27 = vpop.f32.mrb[3].mxu1  ;;  %v404_v28 = vadd.f32 %v403_v25, %v259_v24  ;;  %v622_v29 = vadd.f32 %v621_v26, %v620_v23 }
 0x103   :  { %478 = vst [vmem:[%s1198_s3 + $0x8] sm:$0xff] %v404_v28  ;;  %v493_v31 = vadd.f32 %v404_v28, %v399_v21  ;;  %v516_v32 = vmul.f32 %v404_v28, %v404_v28  ;;  %v623_v33 = vpop.f32.mrb[6].mxu0  ;;  %v264_v34 = vadd.f32 %v622_v29, %v1123_v15 }
 0x104   :  { %v408_v35 = vpop.f32.mrb[4].mxu1  ;;  %v624_v36 = vpop.f32.mrb[7].mxu0 }
 0x105   :  { %v410_v37 = vpop.f32.mrb[5].mxu1  ;;  %v531_v38 = vadd.f32 %v516_v32, %v515_v30  ;;  %v409_v39 = vadd.f32 %v408_v35, %v264_v34  ;;  %v625_v40 = vadd.f32 %v624_v36, %v623_v33 }
 0x107   :  { %479 = vst [vmem:[%s1198_s3 + $0x10] sm:$0xff] %v409_v39  ;;  %v494_v41 = vadd.f32 %v493_v31, %v409_v39  ;;  %v517_v42 = vmul.f32 %v409_v39, %v409_v39  ;;  %v626_v43 = vpop.f32.mrb[8].mxu0  ;;  %v269_v44 = vadd.f32 %v625_v40, %v1123_v15 }
 0x108   :  { %v413_v45 = vpop.f32.mrb[6].mxu1  ;;  %v627_v46 = vpop.f32.mrb[9].mxu0 }
 0x109   :  { %v415_v47 = vpop.f32.mrb[7].mxu1  ;;  %v532_v48 = vadd.f32 %v531_v38, %v517_v42  ;;  %v414_v49 = vadd.f32 %v413_v45, %v269_v44  ;;  %v628_v50 = vadd.f32 %v627_v46, %v626_v43 }
 0x10b   :  { %480 = vst [vmem:[%s1198_s3 + $0x18] sm:$0xff] %v414_v49  ;;  %v495_v51 = vadd.f32 %v494_v41, %v414_v49  ;;  %v518_v52 = vmul.f32 %v414_v49, %v414_v49  ;;  %v629_v53 = vpop.f32.mrb[10].mxu0  ;;  %v274_v54 = vadd.f32 %v628_v50, %v1123_v15 }
 0x10c   :  { %v418_v55 = vpop.f32.mrb[8].mxu1  ;;  %v630_v56 = vpop.f32.mrb[11].mxu0 }
 0x10d   :  { %v420_v57 = vpop.f32.mrb[9].mxu1  ;;  %v533_v58 = vadd.f32 %v532_v48, %v518_v52  ;;  %v419_v59 = vadd.f32 %v418_v55, %v274_v54  ;;  %v631_v60 = vadd.f32 %v630_v56, %v629_v53 }
 0x10f   :  { %481 = vst [vmem:[%s1198_s3 + $0x20] sm:$0xff] %v419_v59  ;;  %v496_v61 = vadd.f32 %v495_v51, %v419_v59  ;;  %v519_v62 = vmul.f32 %v419_v59, %v419_v59  ;;  %v632_v63 = vpop.f32.mrb[12].mxu0  ;;  %v279_v0 = vadd.f32 %v631_v60, %v1123_v15 }
 0x110   :  { %v423_v1 = vpop.f32.mrb[10].mxu1  ;;  %v633_v3 = vpop.f32.mrb[13].mxu0 }
 0x111   :  { %v425_v4 = vpop.f32.mrb[11].mxu1  ;;  %v534_v5 = vadd.f32 %v533_v58, %v519_v62  ;;  %v424_v6 = vadd.f32 %v423_v1, %v279_v0  ;;  %v634_v7 = vadd.f32 %v633_v3, %v632_v63 }
 0x113   :  { %482 = vst [vmem:[%s1198_s3 + $0x28] sm:$0xff] %v424_v6  ;;  %v497_v8 = vadd.f32 %v496_v61, %v424_v6  ;;  %v520_v9 = vmul.f32 %v424_v6, %v424_v6  ;;  %v635_v10 = vpop.f32.mrb[14].mxu0  ;;  %v284_v11 = vadd.f32 %v634_v7, %v1123_v15 }
 0x114   :  { %v428_v12 = vpop.f32.mrb[12].mxu1  ;;  %v636_v13 = vpop.f32.mrb[15].mxu0 }
 0x115   :  { %v430_v14 = vpop.f32.mrb[13].mxu1  ;;  %v535_v16 = vadd.f32 %v534_v5, %v520_v9  ;;  %v429_v17 = vadd.f32 %v428_v12, %v284_v11  ;;  %v637_v18 = vadd.f32 %v636_v13, %v635_v10 }
 0x117   :  { %483 = vst [vmem:[%s1198_s3 + $0x30] sm:$0xff] %v429_v17  ;;  %v498_v19 = vadd.f32 %v497_v8, %v429_v17  ;;  %v521_v2 = vmul.f32 %v429_v17, %v429_v17  ;;  %v638_v20 = vpop.f32.mrb[16].mxu0  ;;  %v289_v21 = vadd.f32 %v637_v18, %v1123_v15 }
 0x118   :  { %v433_v22 = vpop.f32.mrb[14].mxu1  ;;  %v639_v23 = vpop.f32.mrb[17].mxu0 }
 0x119   :  { %v435_v24 = vpop.f32.mrb[15].mxu1  ;;  %v536_v25 = vadd.f32 %v535_v16, %v521_v2  ;;  %v434_v26 = vadd.f32 %v433_v22, %v289_v21  ;;  %v640_v27 = vadd.f32 %v639_v23, %v638_v20 }
 0x11b   :  { %484 = vst [vmem:[%s1198_s3 + $0x38] sm:$0xff] %v434_v26  ;;  %v499_v28 = vadd.f32 %v498_v19, %v434_v26  ;;  %v522_v29 = vmul.f32 %v434_v26, %v434_v26  ;;  %v641_v30 = vpop.f32.mrb[18].mxu0  ;;  %v294_v31 = vadd.f32 %v640_v27, %v1123_v15 }
 0x11c   :  { %v438_v32 = vpop.f32.mrb[16].mxu1  ;;  %v642_v33 = vpop.f32.mrb[19].mxu0 }
 0x11d   :  { %v440_v34 = vpop.f32.mrb[17].mxu1  ;;  %v537_v35 = vadd.f32 %v536_v25, %v522_v29  ;;  %v439_v36 = vadd.f32 %v438_v32, %v294_v31  ;;  %v643_v37 = vadd.f32 %v642_v33, %v641_v30 }
 0x11f   :  { %485 = vst [vmem:[%s1198_s3 + $0x40] sm:$0xff] %v439_v36  ;;  %v500_v38 = vadd.f32 %v499_v28, %v439_v36  ;;  %v523_v39 = vmul.f32 %v439_v36, %v439_v36  ;;  %v644_v40 = vpop.f32.mrb[20].mxu0  ;;  %v299_v41 = vadd.f32 %v643_v37, %v1123_v15 }
 0x120   :  { %v443_v42 = vpop.f32.mrb[18].mxu1  ;;  %v645_v43 = vpop.f32.mrb[21].mxu0 }
 0x121   :  { %v445_v44 = vpop.f32.mrb[19].mxu1  ;;  %v538_v45 = vadd.f32 %v537_v35, %v523_v39  ;;  %v444_v46 = vadd.f32 %v443_v42, %v299_v41  ;;  %v646_v47 = vadd.f32 %v645_v43, %v644_v40 }
 0x123   :  { %486 = vst [vmem:[%s1198_s3 + $0x48] sm:$0xff] %v444_v46  ;;  %v501_v48 = vadd.f32 %v500_v38, %v444_v46  ;;  %v524_v49 = vmul.f32 %v444_v46, %v444_v46  ;;  %v647_v50 = vpop.f32.mrb[22].mxu0  ;;  %v304_v51 = vadd.f32 %v646_v47, %v1123_v15 }
 0x124   :  { %v448_v52 = vpop.f32.mrb[20].mxu1  ;;  %v648_v53 = vpop.f32.mrb[23].mxu0 }
 0x125   :  { %v450_v54 = vpop.f32.mrb[21].mxu1  ;;  %v539_v55 = vadd.f32 %v538_v45, %v524_v49  ;;  %v449_v56 = vadd.f32 %v448_v52, %v304_v51  ;;  %v649_v57 = vadd.f32 %v648_v53, %v647_v50 }
 0x127   :  { %487 = vst [vmem:[%s1198_s3 + $0x50] sm:$0xff] %v449_v56  ;;  %v502_v58 = vadd.f32 %v501_v48, %v449_v56  ;;  %v525_v59 = vmul.f32 %v449_v56, %v449_v56  ;;  %v650_v60 = vpop.f32.mrb[24].mxu0  ;;  %v309_v61 = vadd.f32 %v649_v57, %v1123_v15 }
 0x128   :  { %v453_v62 = vpop.f32.mrb[22].mxu1  ;;  %v651_v63 = vpop.f32.mrb[25].mxu0 }
 0x129   :  { %v455_v0 = vpop.f32.mrb[23].mxu1  ;;  %v540_v1 = vadd.f32 %v539_v55, %v525_v59  ;;  %v454_v3 = vadd.f32 %v453_v62, %v309_v61  ;;  %v652_v4 = vadd.f32 %v651_v63, %v650_v60 }
 0x12b   :  { %488 = vst [vmem:[%s1198_s3 + $0x58] sm:$0xff] %v454_v3  ;;  %v503_v5 = vadd.f32 %v502_v58, %v454_v3  ;;  %v526_v6 = vmul.f32 %v454_v3, %v454_v3  ;;  %v653_v7 = vpop.f32.mrb[26].mxu0  ;;  %v314_v8 = vadd.f32 %v652_v4, %v1123_v15 }
 0x12c   :  { %v458_v9 = vpop.f32.mrb[24].mxu1  ;;  %v654_v10 = vpop.f32.mrb[27].mxu0 }
 0x12d   :  { %v460_v11 = vpop.f32.mrb[25].mxu1  ;;  %v541_v12 = vadd.f32 %v540_v1, %v526_v6  ;;  %v459_v13 = vadd.f32 %v458_v9, %v314_v8  ;;  %v655_v14 = vadd.f32 %v654_v10, %v653_v7 }
 0x12f   :  { %489 = vst [vmem:[%s1198_s3 + $0x60] sm:$0xff] %v459_v13  ;;  %v504_v16 = vadd.f32 %v503_v5, %v459_v13  ;;  %v527_v17 = vmul.f32 %v459_v13, %v459_v13  ;;  %v656_v18 = vpop.f32.mrb[28].mxu0  ;;  %v319_v19 = vadd.f32 %v655_v14, %v1123_v15 }
 0x130   :  { %v463_v2 = vpop.f32.mrb[26].mxu1  ;;  %v657_v20 = vpop.f32.mrb[29].mxu0 }
 0x131   :  { %v465_v21 = vpop.f32.mrb[27].mxu1  ;;  %v542_v22 = vadd.f32 %v541_v12, %v527_v17  ;;  %v464_v23 = vadd.f32 %v463_v2, %v319_v19  ;;  %v658_v24 = vadd.f32 %v657_v20, %v656_v18 }
 0x133   :  { %490 = vst [vmem:[%s1198_s3 + $0x68] sm:$0xff] %v464_v23  ;;  %v505_v25 = vadd.f32 %v504_v16, %v464_v23  ;;  %v528_v26 = vmul.f32 %v464_v23, %v464_v23  ;;  %v659_v27 = vpop.f32.mrb[30].mxu0  ;;  %v324_v28 = vadd.f32 %v658_v24, %v1123_v15 }
 0x134   :  { %v468_v29 = vpop.f32.mrb[28].mxu1  ;;  %v660_v30 = vpop.f32.mrb[31].mxu0 }
 0x135   :  { %v470_v31 = vpop.f32.mrb[29].mxu1  ;;  %v543_v32 = vadd.f32 %v542_v22, %v528_v26  ;;  %v469_v33 = vadd.f32 %v468_v29, %v324_v28  ;;  %v661_v34 = vadd.f32 %v660_v30, %v659_v27 }
 0x137   :  { %491 = vst [vmem:[%s1198_s3 + $0x70] sm:$0xff] %v469_v33  ;;  %v506_v35 = vadd.f32 %v505_v25, %v469_v33  ;;  %v529_v36 = vmul.f32 %v469_v33, %v469_v33  ;;  %v329_v37 = vadd.f32 %v661_v34, %v1123_v15 }
 0x138   :  { %v473_v38 = vpop.f32.mrb[30].mxu1 }
 0x139   :  { %v475_v39 = vpop.f32.mrb[31].mxu1  ;;  %v544_v40 = vadd.f32 %v543_v32, %v529_v36  ;;  %v474_v41 = vadd.f32 %v473_v38, %v329_v37 }
 0x13b   :  { %492 = vst [vmem:[%s1198_s3 + $0x78] sm:$0xff] %v474_v41  ;;  %v507_v42 = vadd.f32 %v506_v35, %v474_v41  ;;  %v530_v43 = vmul.f32 %v474_v41, %v474_v41 }
 0x13d   :  { %v508_v44 = vrot.slane %v507_v42, 4  ;;  %v545_v45 = vadd.f32 %v544_v40, %v530_v43 }
 0x13f   :  { %v509_v46 = vadd.f32 %v508_v44, %v507_v42  ;;  %v546_v47 = vrot.slane %v545_v45, 4 }
 0x141   :  { %v510_v48 = vrot.slane %v509_v46, 2  ;;  %v547_v49 = vadd.f32 %v546_v47, %v545_v45 }
 0x143   :  { %v511_v50 = vadd.f32 %v510_v48, %v509_v46  ;;  %v548_v51 = vrot.slane %v547_v49, 2 }
 0x145   :  { %v512_v52 = vrot.slane %v511_v50, 1  ;;  %v549_v15 = vadd.f32 %v548_v51, %v547_v49 }
 0x147   :  { %v513_v53 = vadd.f32 %v512_v52, %v511_v50  ;;  %v550_v54 = vrot.slane %v549_v15, 1 }
 0x149   :  { %514 = vst [vmem:[%s1199_s4] sm:$0xff] %v513_v53  ;;  %v551_v55 = vadd.f32 %v550_v54, %v549_v15 }
 0x14b   :  { %552 = vst [vmem:[%s1200_s5] sm:$0xff] %v551_v55 }

// kernel: cnn_forward.12
= control target key start
LH: loop header
LB: loop body
LE: loop exit
PB: predicated region body
PF: predicated region fallthrough
CT: control target
= control target key end

     0   :  { %s74_s0 = inlined_call_operand.vmem [shape: f32[8,1024], index: 0, kind: input, shape index: {}]   ;;  %s75_s1 = inlined_call_operand.vmem [shape: f32[8,512], index: 1, kind: output, shape index: {}]  }
   0x1   :  { %v8_v0 = vld [vmem:[%s74_s0] sm:$0xff]  ;;  %v9_v2 = vld [vmem:[%s74_s0 + $0x8] sm:$0xff]  ;;  %v10_v5 = vld [vmem:[%s74_s0 + $0x10] sm:$0xff] }
   0x2   :  { %v12_v1 = vld [vmem:[%s74_s0 + $0x20] sm:$0xff]  ;;  %v13_v4 = vld [vmem:[%s74_s0 + $0x28] sm:$0xff]  ;;  %v14_v6 = vld [vmem:[%s74_s0 + $0x30] sm:$0xff] }
   0x3   :  { %v16_v3 = vmax.f32 %v8_v0, %v12_v1  ;;  %v17_v7 = vmax.f32 %v9_v2, %v13_v4  ;;  %v18_v8 = vmax.f32 %v10_v5, %v14_v6  ;;  %v11_v9 = vld [vmem:[%s74_s0 + $0x18] sm:$0xff] }
   0x4   :  { %v15_v10 = vld [vmem:[%s74_s0 + $0x38] sm:$0xff] }
   0x5   :  { %20 = vst [vmem:[%s75_s1] sm:$0xff] %v16_v3  ;;  %v19_v11 = vmax.f32 %v11_v9, %v15_v10  ;;  %21 = vst [vmem:[%s75_s1 + $0x8] sm:$0xff] %v17_v7 }
   0x6   :  { %22 = vst [vmem:[%s75_s1 + $0x10] sm:$0xff] %v18_v8 }
   0x7   :  { %23 = vst [vmem:[%s75_s1 + $0x18] sm:$0xff] %v19_v11 }

// kernel: cnn_forward.13
= control target key start
LH: loop header
LB: loop body
LE: loop exit
PB: predicated region body
PF: predicated region fallthrough
CT: control target
= control target key end

     0   :  { %v36_v3 = vlaneseq  ;;  %v260_v8 = vmov 1983009808   ;;  %s328_s0 = inlined_call_operand.vmem [shape: f32[2,512], index: 0, kind: input, shape index: {}]   ;;  %s329_s1 = inlined_call_operand.vmem [shape: f32[10,512], index: 1, kind: input, shape index: {}]   ;;  %s330_s2 = inlined_call_operand.vmem [shape: f32[1,10], index: 2, kind: input, shape index: {}]   ;;  %s331_s3 = inlined_call_operand.hbm [shape: f32[2,10], index: 3, kind: output, shape index: {}]  }
   0x1   :  { %v24_v0 = vld [vmem:[%s329_s1 + $0x8] sm:$0xff]  ;;  %v26_v2 = vld [vmem:[%s329_s1 + $0x18] sm:$0xff]  ;;  %v23_v6 = vld [vmem:[%s329_s1] sm:$0xff]  ;;  %v34_v9 = vunpack.c.l.s4 %v260_v8 }
   0x2   :  { %v28_v1 = vld [vmem:[%s329_s1 + $0x28] sm:$0x3]  ;;  %v30_v5 = vld [vmem:[%s329_s1 + $0x38] sm:$0x3]  ;;  %v27_v7 = vld [vmem:[%s329_s1 + $0x20] sm:$0x3] }
   0x3   :  { %v224_v4 = vpack.c.bf16 %v28_v1, %v24_v0  ;;  %v228_v10 = vpack.c.bf16 %v30_v5, %v26_v2  ;;  %v226_v11 = vpack.c.bf16 %v27_v7, %v23_v6  ;;  %v25_v12 = vld [vmem:[%s329_s1 + $0x10] sm:$0xff]  ;;  %v22_v14 = vld [vmem:[%s328_s0] sm:$0xff]  ;;  %v37_v15 = vshrl.u32 %v36_v3, 7 }
   0x4   :  { %v29_v13 = vld [vmem:[%s329_s1 + $0x30] sm:$0x3]  ;;  %v35_v17 = vunpack.c.0.s8 %v34_v9  ;;  %v32_v18 = vcombine.high %v22_v14, %v22_v14 }
   0x5   :  { %225 = vmatprep.subr.bf16.mxu0 %v224_v4  ;;  %v230_v16 = vpack.c.bf16 %v29_v13, %v25_v12 }
   0x6   :  { %8 = vsyncpa [#allocation4], 0  ;;  %229 = vmatprep.subr.bf16.mxu1 %v228_v10  ;;  %227 = vmatpush1.bf16.xpose.msra.mxu0 %v226_v11  ;;  %v38_v19 = vsub.s32 %v35_v17, %v37_v15  ;;  %vm19_vm0 = vcmask 74752   ;;  %v261_v24 = vmov 0.0   ;;  %v223_v32 = vld [vmem:[%s330_s2] ss:$0 sm:$0xff] }
   0x7   :  { %231 = vmatpush1.bf16.xpose.msra.mxu1 %v230_v16  ;;  %20 = vst.msk [vmem:[#allocation2] sm:$0x3] %vm19_vm0, %v261_v24  ;;  %s262_s30 = smov [#allocation3]  }
   0x8   :  { %v39_v20 = vrot.slane %v22_v14, %v38_v19  ;;  %v46_v21 = vrot.slane %v32_v18, %v38_v19  ;;  %s215_s4 = sshll.u32 %s262_s30, 4  ;;  %s216_s4 = int_to_ptr.vmem [resolvable:$true] %s215_s4 }
   0x9   :  { %s236_s5 = scalar_lea.vmem %s216_s4, 32  ;;  %p241_p1 = scmp.lt.s32.totalorder %s216_s4, %s216_s4 }
   0xa   :  { %v47_v22 = vcombine.high %v39_v20, %v39_v20  ;;  %v48_v23 = vcombine.high %v46_v21, %v46_v21  ;;  %p237_p0 = scmp.ne.s32.totalorder %s216_s4, %s236_s5  ;;  %p242_p2 = scmp.lt.s32.totalorder %s236_s5, %s236_s5 }
   0xc   :  { %117 = vmatprep.mubr.f32.mxu0 %v47_v22  ;;  %187 = vmatprep.mubr.f32.mxu1 %v48_v23  ;;  %p243_p3 = por %p242_p2, %p241_p1 }
   0xd   :  { %118 = vmatmul.mubr.f32.vlgmr.msra.gmra.mrb[0].mxu0 %v39_v20 }
   0xe   :  { %188 = vmatmul.mubr.f32.vlgmr.msra.gmra.mrb[0].mxu1 %v46_v21  ;;  %v21_v26 = vld [vmem:[#allocation2] sm:$0x3]  ;;  %p244_p4 = pnand %p243_p3, %p237_p0 }
  0xe0   :  { %v119_v25 = vpop.f32.mrb[0].mxu0 }
  0xe1   :  { %v189_v27 = vpop.f32.mrb[0].mxu1  ;;  %v121_v29 = vpop.f32.mrb[1].mxu0 }
  0xe2   :  { %v190_v28 = vadd.f32 %v189_v27, %v119_v25  ;;  %v191_v30 = vpop.f32.mrb[1].mxu1 }
  0xe4   :  { %v193_v31 = vadd.f32 %v190_v28, %v21_v26 }
  0xe6   :  { %195 = vst.msk [vmem:[#allocation2] sm:$0x3] %vm19_vm0, %v193_v31 }
  0xed   :  { %v199_v33 = vld [vmem:[#allocation2] sm:$0x3] }
  0xee   :  { %v207_v34 = vadd.f32 %v223_v32, %v199_v33 }
  0xf0   :  { %208 = vst.msk [vmem:[#allocation3] sm:$0x3] %vm19_vm0, %v207_v34 }
  0xf1   :  { %247 = shalt.err (!%p244_p4)
}
  0xf2   :  { %s248_s8 = scalar_lea.hbm %s331_s3, 32 }
  0xf3   :  { %p249_p5 = scmp.ne.s32.totalorder %s331_s3, %s248_s8  ;;  %p252_p6 = scmp.lt.u32.totalorder %s248_s8, %s331_s3 }
  0xf5   :  { %p254_p7 = pnand %p252_p6, %p249_p5 }
  0xf7   :  { %257 = shalt.err (!%p254_p7)
}
  0xf8   :  { %218 = dma.vmem_to_hbm [thread:$0]  %s216_s4, 32, %s331_s3, [#allocation4]  }
  0xf9   :  { %258 = dma.done.wait [#allocation4], 32  }
  0xfa   :  { %259 = vsyncadd [#allocation4], 4294967264 }
  0xfb   :  { %222 = vsyncpa [#allocation4], 1 }

</bundles_post_ra>
